<compile_context>
chip_gen: v7x
topology: tpu7x:2x2x1
jax: 0.10.0
libtpu: 0.0.40
codegen_flags: <defaults>
</compile_context>

<pallas_src>
import functools

import jax
import jax.numpy as jnp
import numpy as np
from jax.experimental import pallas as pl
from jax.experimental.pallas import tpu as pltpu


# ---------------- packed-weight-blob layout (row offsets, 256 lanes wide, bf16) ------------
_TAPROWS = 9 * 64          # rows 0:576   lanes 0:128 = w2 per-tap stack, lanes 128:192 = S_d stack
_W1_R    = _TAPROWS        # rows 576:608 lanes 0:64  = conv1 im2col weight (32, 64) incl. bias row
_WQ_R    = _W1_R + 32      # rows 608:624 lanes 0:128 = wq (scale folded), lanes 128:192 = pool mat
_WKV_R   = _WQ_R + 16      # rows 624:752 lanes 0:256 = fused [k | v] weight (128-lane aligned)
_WO_R    = _WKV_R + 128    # rows 752:880 lanes 0:256 = output projection (padded)
_BLOB_R  = _WO_R + 128     # 880 rows total
_BLOB_C  = 256


# ---------------- the single fused Pallas kernel ----------------

def _fused_kernel(patches_ref, emb_ref, blob_ref, bias_ref, o_ref):
    f32, bf16 = jnp.float32, jnp.bfloat16

    # ---- conv1 + bias + ReLU as ONE im2col matmul; MaxPool2d(2,2) fused as 4-way max ----
    # patches rows are phase-major: rows [p*64,(p+1)*64) are maxpool phase p, row within a
    # phase = i*8 + j (pooled output position). conv1 bias is folded via the ones column.
    w1 = blob_ref[_W1_R:_W1_R + 32, 0:64]                                   # (32, 64)  bf16
    c1 = jnp.dot(patches_ref[...], w1, preferred_element_type=f32)          # (256, 64) f32
    c1 = jnp.maximum(c1, 0.0)
    p1 = jnp.maximum(jnp.maximum(c1[0:64], c1[64:128]),
                     jnp.maximum(c1[128:192], c1[192:256]))                 # (64, 64)
    p1b = p1.astype(bf16)

    # ---- conv2: 9 taps, each = constant shift/mask matmul + weight matmul (all MXU) -----
    # S_d @ p1 gathers rows (h+dy, w+dx) with zero padding: no retiled slices, no masked
    # scratch stores, no VMEM pad buffer.
    acc2 = None
    for d in range(9):
        r0 = d * 64
        s_d  = blob_ref[r0:r0 + 64, 128:192]                                # (64, 64)  bf16
        w2_d = blob_ref[r0:r0 + 64, 0:128]                                  # (64, 128) bf16
        g = jnp.dot(s_d, p1b, preferred_element_type=f32).astype(bf16)      # exact row gather
        part = jnp.dot(g, w2_d, preferred_element_type=f32)                 # (64, 128) f32
        acc2 = part if acc2 is None else acc2 + part
    b2 = bias_ref[0:1, 0:128]
    y2 = jnp.maximum(acc2 + b2, 0.0)                                        # (64, 128)

    # ---- AdaptiveAvgPool2d((4,4)) on an 8x8 map == exact 2x2 mean == constant matmul ----
    pool = blob_ref[_WQ_R:_WQ_R + 16, 128:192].astype(f32)                  # (16, 64)
    feat = jnp.dot(pool, y2, preferred_element_type=f32)                    # (16, 128)

    # ---- q / fused k,v projections (1/sqrt(128) pre-folded into wq, bq) ------------------
    wq = blob_ref[_WQ_R:_WQ_R + 16, 0:128].astype(f32)                      # (16, 128)
    q = jnp.dot(emb_ref[...], wq, preferred_element_type=f32) \
        + bias_ref[1:2, 0:128]                                              # (1, 128)
    wkv = blob_ref[_WKV_R:_WKV_R + 128, :]                                  # (128, 256) bf16
    kv = jnp.dot(feat.astype(bf16), wkv,
                 preferred_element_type=f32) + bias_ref[2:3, :]             # (16, 256)
    k = kv[:, 0:128]                                                        # 128-lane aligned
    v = kv[:, 128:256]

    # ---- single-query softmax attention + output projection -----------------------------
    scores = jax.lax.dot_general(q, k, (((1,), (1,)), ((), ())),
                                 preferred_element_type=f32)                # (1, 16)
    m = jnp.max(scores, axis=-1, keepdims=True)
    e = jnp.exp(scores - m)
    wts = e / jnp.sum(e, axis=-1, keepdims=True)
    ctx = jnp.dot(wts, v, preferred_element_type=f32)                       # (1, 128)
    wo = blob_ref[_WO_R:_WO_R + 128, :]                                     # (128, 256) bf16
    o_ref[...] = jnp.dot(ctx.astype(bf16), wo,
                         preferred_element_type=f32) + bias_ref[3:4, :]     # (1, 256)


# ---------------- wrapper (one-gather glue + pallas_call) ----------------

def cross_attention_forward(kparams, image, embedding, *, out_dim):
    # image: (1, Cin, 16, 16) NCHW; batch must be 1 (torch.bmm with a (1,1,H) query).
    assert image.shape[0] == 1 and image.shape[2:] == (16, 16)

    # Single-gather im2col of the input image (zero padding + folded ones column baked into
    # the precomputed index table; indices 9*cin -> 1.0, out-of-bounds / pad lanes -> 0.0).
    flat = image.reshape(-1).astype(jnp.float32)
    src = jnp.concatenate([flat, jnp.array([0.0, 1.0], jnp.float32)])
    patches = jnp.take(src, kparams["gather_idx"], axis=0).astype(jnp.bfloat16)  # (256, 32)
    emb = embedding.reshape(1, -1).astype(jnp.float32)                           # (1, 16)

    args = (patches, emb, kparams["blob"], kparams["bias"])

    def full_spec(a):
        shp = a.shape
        return pl.BlockSpec(shp, lambda i, _n=len(shp): (0,) * _n)

    flops = int(2 * (256 * 32 * 64                              # conv1 im2col matmul
                     + 9 * (64 * 64 * 64 + 64 * 64 * 128)       # conv2 gather + tap matmuls
                     + 16 * 64 * 128                            # avg-pool matmul
                     + 16 * 128 * 256                           # fused k,v projection
                     + 2 * 16 * 128 + 16 * 128                  # q / scores / context
                     + 128 * 256))                              # out projection
    bytes_accessed = int(sum(int(a.size) * a.dtype.itemsize for a in args) + 4 * _BLOB_C)

    out = pl.pallas_call(
        _fused_kernel,
        out_shape=jax.ShapeDtypeStruct((1, _BLOB_C), jnp.float32),
        grid=(1,),
        in_specs=[full_spec(a) for a in args],
        out_specs=pl.BlockSpec((1, _BLOB_C), lambda i: (0, 0)),
        compiler_params=pltpu.CompilerParams(dimension_semantics=("arbitrary",)),
        cost_estimate=pl.CostEstimate(flops=flops, transcendentals=16,
                                      bytes_accessed=bytes_accessed),
    )(*args)
    return out[:, :out_dim]


# ---------------- parameters: torch-layout init + one-time kernel re-layout ----------------

def init_params(key, img_channels=3, hidden_dim=128, out_dim=255):
    ks = jax.random.split(key, 6)

    def kaiming_fan_out(k, shape):
        fan_out = shape[0] * shape[2] * shape[3]
        return ((2.0 / fan_out) ** 0.5) * jax.random.normal(k, shape, jnp.float32)

    # NOTE: torch uses xavier_uniform gain=0.01; gain=1.0 keeps activations in a numerically
    # healthy range for verification (shapes / forward math are identical).
    def xavier(k, shape, gain=1.0):
        fan_out, fan_in = shape
        bound = gain * (6.0 / (fan_in + fan_out)) ** 0.5
        return jax.random.uniform(k, shape, jnp.float32, -bound, bound)

    return {
        "conv1_w": kaiming_fan_out(ks[0], (64, img_channels, 3, 3)),
        "conv1_b": jnp.zeros((64,), jnp.float32),
        "conv2_w": kaiming_fan_out(ks[1], (128, 64, 3, 3)),
        "conv2_b": jnp.zeros((128,), jnp.float32),
        "q_w": xavier(ks[2], (hidden_dim, 4 * 4)),
        "q_b": jnp.zeros((hidden_dim,), jnp.float32),
        "k_w": xavier(ks[3], (hidden_dim, 128)),
        "k_b": jnp.zeros((hidden_dim,), jnp.float32),
        "v_w": xavier(ks[4], (hidden_dim, 128)),
        "v_b": jnp.zeros((hidden_dim,), jnp.float32),
        "o_w": xavier(ks[5], (out_dim, hidden_dim)),
        "o_b": jnp.zeros((out_dim,), jnp.float32),
    }


def prepare_kernel_params(params):
    """One-time re-layout of torch-layout params into one bf16 blob + f32 bias + gather idx."""
    W1 = np.asarray(params["conv1_w"])        # (64, cin, 3, 3)
    W2 = np.asarray(params["conv2_w"])        # (128, 64, 3, 3)
    cin = W1.shape[1]
    H = np.asarray(params["q_w"]).shape[0]
    out_dim = np.asarray(params["o_w"]).shape[0]
    assert 9 * cin + 1 <= 32, "conv1 im2col layout supports img_channels <= 3"
    assert H <= 128 and out_dim <= 256

    # conv1 weight as a (32, 64) im2col matrix; row 9*cin carries the bias (ones column).
    w1_mat = np.zeros((32, 64), np.float32)
    for ky in range(3):
        for kx in range(3):
            for ci in range(cin):
                w1_mat[(ky * 3 + kx) * cin + ci, :] = W1[:, ci, ky, kx]
    w1_mat[9 * cin, :] = np.asarray(params["conv1_b"])

    # conv2: per-tap weights (576,128) + per-tap shift/zero-pad gather matrices (576,64).
    w2_stack = np.zeros((_TAPROWS, 128), np.float32)
    s_stack = np.zeros((_TAPROWS, 64), np.float32)
    for ky in range(3):
        for kx in range(3):
            d = ky * 3 + kx
            w2_stack[d * 64:(d + 1) * 64, :] = W2[:, :, ky, kx].T
            dy, dx = ky - 1, kx - 1
            for h in range(8):
                for w in range(8):
                    hh, ww = h + dy, w + dx
                    if 0 <= hh < 8 and 0 <= ww < 8:
                        s_stack[d * 64 + h * 8 + w, hh * 8 + ww] = 1.0

    # AdaptiveAvgPool2d((4,4)) on 8x8 == exact 2x2 mean == (16, 64) matrix over p1 rows.
    pool = np.zeros((16, 64), np.float32)
    for u in range(4):
        for v in range(4):
            for a in range(2):
                for b in range(2):
                    pool[u * 4 + v, (2 * u + a) * 8 + (2 * v + b)] = 0.25

    scale = 1.0 / np.sqrt(128.0)              # matches `/ 128 ** 0.5` in the torch forward
    wq_pad = np.zeros((16, 128), np.float32)
    wq_pad[:, :H] = np.asarray(params["q_w"]).T * scale
    wkv = np.zeros((128, 256), np.float32)
    wkv[:, :H] = np.asarray(params["k_w"]).T
    wkv[:, 128:128 + H] = np.asarray(params["v_w"]).T
    wo_pad = np.zeros((128, 256), np.float32)
    wo_pad[:H, :out_dim] = np.asarray(params["o_w"]).T

    blob = np.zeros((_BLOB_R, _BLOB_C), np.float32)
    blob[0:_TAPROWS, 0:128] = w2_stack
    blob[0:_TAPROWS, 128:192] = s_stack
    blob[_W1_R:_W1_R + 32, 0:64] = w1_mat
    blob[_WQ_R:_WQ_R + 16, 0:128] = wq_pad
    blob[_WQ_R:_WQ_R + 16, 128:192] = pool
    blob[_WKV_R:_WKV_R + 128, :] = wkv
    blob[_WO_R:_WO_R + 128, :] = wo_pad

    bias = np.zeros((8, _BLOB_C), np.float32)
    bias[0, 0:128] = np.asarray(params["conv2_b"])
    bias[1, :H] = np.asarray(params["q_b"]) * scale
    bias[2, :H] = np.asarray(params["k_b"])
    bias[2, 128:128 + H] = np.asarray(params["v_b"])
    bias[3, :out_dim] = np.asarray(params["o_b"])

    # conv1 im2col gather indices into concat([image.reshape(-1), [0.0, 1.0]]):
    # row = phase*64 + i*8 + j (phase = a*2 + b), col = (ky*3+kx)*cin + ci; OOB -> 0.0,
    # col 9*cin -> 1.0 (folded bias), remaining pad cols -> 0.0.
    zero_idx = cin * 256
    one_idx = zero_idx + 1
    idx = np.full((256, 32), zero_idx, np.int32)
    for a in range(2):
        for b in range(2):
            p = a * 2 + b
            for i in range(8):
                for j in range(8):
                    r = p * 64 + i * 8 + j
                    for ky in range(3):
                        for kx in range(3):
                            y, x = 2 * i + a + ky - 1, 2 * j + b + kx - 1
                            if 0 <= y < 16 and 0 <= x < 16:
                                for ci in range(cin):
                                    idx[r, (ky * 3 + kx) * cin + ci] = ci * 256 + y * 16 + x
    idx[:, 9 * cin] = one_idx

    return {"blob": jnp.asarray(blob, jnp.bfloat16),
            "bias": jnp.asarray(bias, jnp.float32),
            "gather_idx": jnp.asarray(idx)}


# ---------------- pure-JAX reference (for correctness check) ----------------

def reference_forward(params, image_nchw, embedding):
    x = jnp.transpose(image_nchw, (0, 2, 3, 1)).astype(jnp.float32)

    def conv(x, w_oihw, b):
        w = jnp.transpose(w_oihw, (2, 3, 1, 0))  # HWIO
        y = jax.lax.conv_general_dilated(
            x, w, (1, 1), "SAME", dimension_numbers=("NHWC", "HWIO", "NHWC"))
        return y + b

    y = jnp.maximum(conv(x, params["conv1_w"], params["conv1_b"]), 0.0)
    y = jax.lax.reduce_window(y, -jnp.inf, jax.lax.max,
                              (1, 2, 2, 1), (1, 2, 2, 1), "VALID")
    y = jnp.maximum(conv(y, params["conv2_w"], params["conv2_b"]), 0.0)
    y = jax.lax.reduce_window(y, 0.0, jax.lax.add,
                              (1, 2, 2, 1), (1, 2, 2, 1), "VALID") / 4.0
    img_feat = y.reshape(1, 16, 128)[0]                              # (16, 128)
    embed_flat = embedding.reshape(1, -1).astype(jnp.float32)        # (1, 16)
    query = embed_flat @ params["q_w"].T + params["q_b"]             # (1, H)
    key = img_feat @ params["k_w"].T + params["k_b"]                 # (16, H)
    value = img_feat @ params["v_w"].T + params["v_b"]
    scores = (query @ key.T) / (128.0 ** 0.5)
    weights = jax.nn.softmax(scores, axis=-1)
    ctx = weights @ value
    return ctx @ params["o_w"].T + params["o_b"]


if __name__ == "__main__":
    key = jax.random.PRNGKey(0)
    kp, ki, ke = jax.random.split(key, 3)

    img_channels, hidden_dim, out_dim = 3, 128, 255      # module defaults
    params = init_params(kp, img_channels, hidden_dim, out_dim)
    kparams = prepare_kernel_params(params)              # one-time weight packing / re-layout

    image = jax.random.normal(ki, (1, img_channels, 16, 16), jnp.float32)  # batch=1 (bmm)
    embedding = jax.random.normal(ke, (4, 4), jnp.float32)                 # 4*4 = 16 features

    fwd = jax.jit(functools.partial(cross_attention_forward, out_dim=out_dim))
    out = jax.block_until_ready(fwd(kparams, image, embedding))
    ref = jax.block_until_ready(reference_forward(params, image, embedding))

    assert out.shape == (1, out_dim), out.shape
    assert bool(jnp.all(jnp.isfinite(out)))
    scale = float(jnp.max(jnp.abs(ref))) + 1e-6
    np.testing.assert_allclose(np.asarray(out), np.asarray(ref),
                               rtol=2e-2, atol=2e-2 * scale)
    print("KERNEL_OK")
</pallas_src>

<mosaic_0001>
module attributes {stable_mosaic.version = 11 : i64} {
  func.func @_fused_kernel(%arg0: i32, %arg1: memref<256x32xbf16, #tpu.memory_space<vmem>>, %arg2: memref<1x16xf32, #tpu.memory_space<vmem>>, %arg3: memref<880x256xbf16, #tpu.memory_space<vmem>>, %arg4: memref<8x256xf32, #tpu.memory_space<vmem>>, %arg5: memref<1x256xf32, #tpu.memory_space<vmem>>) attributes {dimension_semantics = [#tpu.dimension_semantics<arbitrary>], iteration_bounds = array<i64: 1>, scalar_prefetch = 0 : i64, scratch_operands = 0 : i64, tpu.core_type = #tpu.core_type<tc>, window_params = [{pipeline_mode = #tpu.pipeline_mode<synchronous>, transform_indices = @transform_0, window_bounds = array<i64: 256, 32>}, {pipeline_mode = #tpu.pipeline_mode<synchronous>, transform_indices = @transform_1, window_bounds = array<i64: 1, 16>}, {pipeline_mode = #tpu.pipeline_mode<synchronous>, transform_indices = @transform_2, window_bounds = array<i64: 880, 256>}, {pipeline_mode = #tpu.pipeline_mode<synchronous>, transform_indices = @transform_3, window_bounds = array<i64: 8, 256>}, {pipeline_mode = #tpu.pipeline_mode<synchronous>, transform_indices = @transform_4, window_bounds = array<i64: 1, 256>}]} {
    %c576 = arith.constant 576 : index
    %c0 = arith.constant 0 : index
    %0 = vector.load %arg3[%c576, %c0] : memref<880x256xbf16, #tpu.memory_space<vmem>>, vector<32x64xbf16>
    %c0_0 = arith.constant 0 : index
    %c0_1 = arith.constant 0 : index
    %1 = vector.load %arg1[%c0_0, %c0_1] : memref<256x32xbf16, #tpu.memory_space<vmem>>, vector<256x32xbf16>
    %cst = arith.constant dense<0.000000e+00> : vector<256x64xf32>
    %2 = tpu.matmul %1, %0, %cst {dimension_numbers = #tpu.dot_dimension_numbers<[1], [0], [0], [1], [0, 0, 1, 1], [], []>} : vector<256x32xbf16>, vector<32x64xbf16>, vector<256x64xf32> -> vector<256x64xf32>
    %cst_2 = arith.constant 0.000000e+00 : f32
    %3 = vector.broadcast %cst_2 : f32 to vector<256x64xf32>
    %4 = arith.maximumf %2, %3 : vector<256x64xf32>
    %5 = vector.extract_strided_slice %4 {offsets = [0, 0], sizes = [64, 64], strides = [1, 1]} : vector<256x64xf32> to vector<64x64xf32>
    %6 = vector.extract_strided_slice %4 {offsets = [64, 0], sizes = [64, 64], strides = [1, 1]} : vector<256x64xf32> to vector<64x64xf32>
    %7 = arith.maximumf %5, %6 : vector<64x64xf32>
    %8 = vector.extract_strided_slice %4 {offsets = [128, 0], sizes = [64, 64], strides = [1, 1]} : vector<256x64xf32> to vector<64x64xf32>
    %9 = vector.extract_strided_slice %4 {offsets = [192, 0], sizes = [64, 64], strides = [1, 1]} : vector<256x64xf32> to vector<64x64xf32>
    %10 = arith.maximumf %8, %9 : vector<64x64xf32>
    %11 = arith.maximumf %7, %10 : vector<64x64xf32>
    %12 = arith.truncf %11 : vector<64x64xf32> to vector<64x64xbf16>
    %c0_3 = arith.constant 0 : index
    %c128 = arith.constant 128 : index
    %13 = vector.load %arg3[%c0_3, %c128] : memref<880x256xbf16, #tpu.memory_space<vmem>>, vector<64x64xbf16>
    %c0_4 = arith.constant 0 : index
    %c0_5 = arith.constant 0 : index
    %14 = vector.load %arg3[%c0_4, %c0_5] : memref<880x256xbf16, #tpu.memory_space<vmem>>, vector<64x128xbf16>
    %cst_6 = arith.constant dense<0.000000e+00> : vector<64x64xf32>
    %15 = tpu.matmul %13, %12, %cst_6 {dimension_numbers = #tpu.dot_dimension_numbers<[1], [0], [0], [1], [0, 0, 1, 1], [], []>} : vector<64x64xbf16>, vector<64x64xbf16>, vector<64x64xf32> -> vector<64x64xf32>
    %16 = arith.truncf %15 : vector<64x64xf32> to vector<64x64xbf16>
    %cst_7 = arith.constant dense<0.000000e+00> : vector<64x128xf32>
    %17 = tpu.matmul %16, %14, %cst_7 {dimension_numbers = #tpu.dot_dimension_numbers<[1], [0], [0], [1], [0, 0, 1, 1], [], []>} : vector<64x64xbf16>, vector<64x128xbf16>, vector<64x128xf32> -> vector<64x128xf32>
    %c64 = arith.constant 64 : index
    %c128_8 = arith.constant 128 : index
    %18 = vector.load %arg3[%c64, %c128_8] : memref<880x256xbf16, #tpu.memory_space<vmem>>, vector<64x64xbf16>
    %c64_9 = arith.constant 64 : index
    %c0_10 = arith.constant 0 : index
    %19 = vector.load %arg3[%c64_9, %c0_10] : memref<880x256xbf16, #tpu.memory_space<vmem>>, vector<64x128xbf16>
    %cst_11 = arith.constant dense<0.000000e+00> : vector<64x64xf32>
    %20 = tpu.matmul %18, %12, %cst_11 {dimension_numbers = #tpu.dot_dimension_numbers<[1], [0], [0], [1], [0, 0, 1, 1], [], []>} : vector<64x64xbf16>, vector<64x64xbf16>, vector<64x64xf32> -> vector<64x64xf32>
    %21 = arith.truncf %20 : vector<64x64xf32> to vector<64x64xbf16>
    %cst_12 = arith.constant dense<0.000000e+00> : vector<64x128xf32>
    %22 = tpu.matmul %21, %19, %cst_12 {dimension_numbers = #tpu.dot_dimension_numbers<[1], [0], [0], [1], [0, 0, 1, 1], [], []>} : vector<64x64xbf16>, vector<64x128xbf16>, vector<64x128xf32> -> vector<64x128xf32>
    %23 = arith.addf %17, %22 : vector<64x128xf32>
    %c128_13 = arith.constant 128 : index
    %c128_14 = arith.constant 128 : index
    %24 = vector.load %arg3[%c128_13, %c128_14] : memref<880x256xbf16, #tpu.memory_space<vmem>>, vector<64x64xbf16>
    %c128_15 = arith.constant 128 : index
    %c0_16 = arith.constant 0 : index
    %25 = vector.load %arg3[%c128_15, %c0_16] : memref<880x256xbf16, #tpu.memory_space<vmem>>, vector<64x128xbf16>
    %cst_17 = arith.constant dense<0.000000e+00> : vector<64x64xf32>
    %26 = tpu.matmul %24, %12, %cst_17 {dimension_numbers = #tpu.dot_dimension_numbers<[1], [0], [0], [1], [0, 0, 1, 1], [], []>} : vector<64x64xbf16>, vector<64x64xbf16>, vector<64x64xf32> -> vector<64x64xf32>
    %27 = arith.truncf %26 : vector<64x64xf32> to vector<64x64xbf16>
    %cst_18 = arith.constant dense<0.000000e+00> : vector<64x128xf32>
    %28 = tpu.matmul %27, %25, %cst_18 {dimension_numbers = #tpu.dot_dimension_numbers<[1], [0], [0], [1], [0, 0, 1, 1], [], []>} : vector<64x64xbf16>, vector<64x128xbf16>, vector<64x128xf32> -> vector<64x128xf32>
    %29 = arith.addf %23, %28 : vector<64x128xf32>
    %c192 = arith.constant 192 : index
    %c128_19 = arith.constant 128 : index
    %30 = vector.load %arg3[%c192, %c128_19] : memref<880x256xbf16, #tpu.memory_space<vmem>>, vector<64x64xbf16>
    %c192_20 = arith.constant 192 : index
    %c0_21 = arith.constant 0 : index
    %31 = vector.load %arg3[%c192_20, %c0_21] : memref<880x256xbf16, #tpu.memory_space<vmem>>, vector<64x128xbf16>
    %cst_22 = arith.constant dense<0.000000e+00> : vector<64x64xf32>
    %32 = tpu.matmul %30, %12, %cst_22 {dimension_numbers = #tpu.dot_dimension_numbers<[1], [0], [0], [1], [0, 0, 1, 1], [], []>} : vector<64x64xbf16>, vector<64x64xbf16>, vector<64x64xf32> -> vector<64x64xf32>
    %33 = arith.truncf %32 : vector<64x64xf32> to vector<64x64xbf16>
    %cst_23 = arith.constant dense<0.000000e+00> : vector<64x128xf32>
    %34 = tpu.matmul %33, %31, %cst_23 {dimension_numbers = #tpu.dot_dimension_numbers<[1], [0], [0], [1], [0, 0, 1, 1], [], []>} : vector<64x64xbf16>, vector<64x128xbf16>, vector<64x128xf32> -> vector<64x128xf32>
    %35 = arith.addf %29, %34 : vector<64x128xf32>
    %c256 = arith.constant 256 : index
    %c128_24 = arith.constant 128 : index
    %36 = vector.load %arg3[%c256, %c128_24] : memref<880x256xbf16, #tpu.memory_space<vmem>>, vector<64x64xbf16>
    %c256_25 = arith.constant 256 : index
    %c0_26 = arith.constant 0 : index
    %37 = vector.load %arg3[%c256_25, %c0_26] : memref<880x256xbf16, #tpu.memory_space<vmem>>, vector<64x128xbf16>
    %cst_27 = arith.constant dense<0.000000e+00> : vector<64x64xf32>
    %38 = tpu.matmul %36, %12, %cst_27 {dimension_numbers = #tpu.dot_dimension_numbers<[1], [0], [0], [1], [0, 0, 1, 1], [], []>} : vector<64x64xbf16>, vector<64x64xbf16>, vector<64x64xf32> -> vector<64x64xf32>
    %39 = arith.truncf %38 : vector<64x64xf32> to vector<64x64xbf16>
    %cst_28 = arith.constant dense<0.000000e+00> : vector<64x128xf32>
    %40 = tpu.matmul %39, %37, %cst_28 {dimension_numbers = #tpu.dot_dimension_numbers<[1], [0], [0], [1], [0, 0, 1, 1], [], []>} : vector<64x64xbf16>, vector<64x128xbf16>, vector<64x128xf32> -> vector<64x128xf32>
    %41 = arith.addf %35, %40 : vector<64x128xf32>
    %c320 = arith.constant 320 : index
    %c128_29 = arith.constant 128 : index
    %42 = vector.load %arg3[%c320, %c128_29] : memref<880x256xbf16, #tpu.memory_space<vmem>>, vector<64x64xbf16>
    %c320_30 = arith.constant 320 : index
    %c0_31 = arith.constant 0 : index
    %43 = vector.load %arg3[%c320_30, %c0_31] : memref<880x256xbf16, #tpu.memory_space<vmem>>, vector<64x128xbf16>
    %cst_32 = arith.constant dense<0.000000e+00> : vector<64x64xf32>
    %44 = tpu.matmul %42, %12, %cst_32 {dimension_numbers = #tpu.dot_dimension_numbers<[1], [0], [0], [1], [0, 0, 1, 1], [], []>} : vector<64x64xbf16>, vector<64x64xbf16>, vector<64x64xf32> -> vector<64x64xf32>
    %45 = arith.truncf %44 : vector<64x64xf32> to vector<64x64xbf16>
    %cst_33 = arith.constant dense<0.000000e+00> : vector<64x128xf32>
    %46 = tpu.matmul %45, %43, %cst_33 {dimension_numbers = #tpu.dot_dimension_numbers<[1], [0], [0], [1], [0, 0, 1, 1], [], []>} : vector<64x64xbf16>, vector<64x128xbf16>, vector<64x128xf32> -> vector<64x128xf32>
    %47 = arith.addf %41, %46 : vector<64x128xf32>
    %c384 = arith.constant 384 : index
    %c128_34 = arith.constant 128 : index
    %48 = vector.load %arg3[%c384, %c128_34] : memref<880x256xbf16, #tpu.memory_space<vmem>>, vector<64x64xbf16>
    %c384_35 = arith.constant 384 : index
    %c0_36 = arith.constant 0 : index
    %49 = vector.load %arg3[%c384_35, %c0_36] : memref<880x256xbf16, #tpu.memory_space<vmem>>, vector<64x128xbf16>
    %cst_37 = arith.constant dense<0.000000e+00> : vector<64x64xf32>
    %50 = tpu.matmul %48, %12, %cst_37 {dimension_numbers = #tpu.dot_dimension_numbers<[1], [0], [0], [1], [0, 0, 1, 1], [], []>} : vector<64x64xbf16>, vector<64x64xbf16>, vector<64x64xf32> -> vector<64x64xf32>
    %51 = arith.truncf %50 : vector<64x64xf32> to vector<64x64xbf16>
    %cst_38 = arith.constant dense<0.000000e+00> : vector<64x128xf32>
    %52 = tpu.matmul %51, %49, %cst_38 {dimension_numbers = #tpu.dot_dimension_numbers<[1], [0], [0], [1], [0, 0, 1, 1], [], []>} : vector<64x64xbf16>, vector<64x128xbf16>, vector<64x128xf32> -> vector<64x128xf32>
    %53 = arith.addf %47, %52 : vector<64x128xf32>
    %c448 = arith.constant 448 : index
    %c128_39 = arith.constant 128 : index
    %54 = vector.load %arg3[%c448, %c128_39] : memref<880x256xbf16, #tpu.memory_space<vmem>>, vector<64x64xbf16>
    %c448_40 = arith.constant 448 : index
    %c0_41 = arith.constant 0 : index
    %55 = vector.load %arg3[%c448_40, %c0_41] : memref<880x256xbf16, #tpu.memory_space<vmem>>, vector<64x128xbf16>
    %cst_42 = arith.constant dense<0.000000e+00> : vector<64x64xf32>
    %56 = tpu.matmul %54, %12, %cst_42 {dimension_numbers = #tpu.dot_dimension_numbers<[1], [0], [0], [1], [0, 0, 1, 1], [], []>} : vector<64x64xbf16>, vector<64x64xbf16>, vector<64x64xf32> -> vector<64x64xf32>
    %57 = arith.truncf %56 : vector<64x64xf32> to vector<64x64xbf16>
    %cst_43 = arith.constant dense<0.000000e+00> : vector<64x128xf32>
    %58 = tpu.matmul %57, %55, %cst_43 {dimension_numbers = #tpu.dot_dimension_numbers<[1], [0], [0], [1], [0, 0, 1, 1], [], []>} : vector<64x64xbf16>, vector<64x128xbf16>, vector<64x128xf32> -> vector<64x128xf32>
    %59 = arith.addf %53, %58 : vector<64x128xf32>
    %c512 = arith.constant 512 : index
    %c128_44 = arith.constant 128 : index
    %60 = vector.load %arg3[%c512, %c128_44] : memref<880x256xbf16, #tpu.memory_space<vmem>>, vector<64x64xbf16>
    %c512_45 = arith.constant 512 : index
    %c0_46 = arith.constant 0 : index
    %61 = vector.load %arg3[%c512_45, %c0_46] : memref<880x256xbf16, #tpu.memory_space<vmem>>, vector<64x128xbf16>
    %cst_47 = arith.constant dense<0.000000e+00> : vector<64x64xf32>
    %62 = tpu.matmul %60, %12, %cst_47 {dimension_numbers = #tpu.dot_dimension_numbers<[1], [0], [0], [1], [0, 0, 1, 1], [], []>} : vector<64x64xbf16>, vector<64x64xbf16>, vector<64x64xf32> -> vector<64x64xf32>
    %63 = arith.truncf %62 : vector<64x64xf32> to vector<64x64xbf16>
    %cst_48 = arith.constant dense<0.000000e+00> : vector<64x128xf32>
    %64 = tpu.matmul %63, %61, %cst_48 {dimension_numbers = #tpu.dot_dimension_numbers<[1], [0], [0], [1], [0, 0, 1, 1], [], []>} : vector<64x64xbf16>, vector<64x128xbf16>, vector<64x128xf32> -> vector<64x128xf32>
    %65 = arith.addf %59, %64 : vector<64x128xf32>
    %c0_49 = arith.constant 0 : index
    %c0_50 = arith.constant 0 : index
    %66 = vector.load %arg4[%c0_49, %c0_50] : memref<8x256xf32, #tpu.memory_space<vmem>>, vector<1x128xf32>
    %67 = vector.broadcast %66 : vector<1x128xf32> to vector<64x128xf32>
    %68 = arith.addf %65, %67 : vector<64x128xf32>
    %cst_51 = arith.constant 0.000000e+00 : f32
    %69 = vector.broadcast %cst_51 : f32 to vector<64x128xf32>
    %70 = arith.maximumf %68, %69 : vector<64x128xf32>
    %c608 = arith.constant 608 : index
    %c128_52 = arith.constant 128 : index
    %71 = vector.load %arg3[%c608, %c128_52] : memref<880x256xbf16, #tpu.memory_space<vmem>>, vector<16x64xbf16>
    %72 = arith.extf %71 : vector<16x64xbf16> to vector<16x64xf32>
    %cst_53 = arith.constant dense<0.000000e+00> : vector<16x128xf32>
    %73 = tpu.matmul %72, %70, %cst_53 {dimension_numbers = #tpu.dot_dimension_numbers<[1], [0], [0], [1], [0, 0, 1, 1], [], []>} : vector<16x64xf32>, vector<64x128xf32>, vector<16x128xf32> -> vector<16x128xf32>
    %c608_54 = arith.constant 608 : index
    %c0_55 = arith.constant 0 : index
    %74 = vector.load %arg3[%c608_54, %c0_55] : memref<880x256xbf16, #tpu.memory_space<vmem>>, vector<16x128xbf16>
    %75 = arith.extf %74 : vector<16x128xbf16> to vector<16x128xf32>
    %c0_56 = arith.constant 0 : index
    %c0_57 = arith.constant 0 : index
    %76 = vector.load %arg2[%c0_56, %c0_57] : memref<1x16xf32, #tpu.memory_space<vmem>>, vector<1x16xf32>
    %cst_58 = arith.constant dense<0.000000e+00> : vector<1x128xf32>
    %77 = tpu.matmul %76, %75, %cst_58 {dimension_numbers = #tpu.dot_dimension_numbers<[1], [0], [0], [1], [0, 0, 1, 1], [], []>} : vector<1x16xf32>, vector<16x128xf32>, vector<1x128xf32> -> vector<1x128xf32>
    %c1 = arith.constant 1 : index
    %c0_59 = arith.constant 0 : index
    %78 = vector.load %arg4[%c1, %c0_59] : memref<8x256xf32, #tpu.memory_space<vmem>>, vector<1x128xf32>
    %79 = arith.addf %77, %78 : vector<1x128xf32>
    %c624 = arith.constant 624 : index
    %c0_60 = arith.constant 0 : index
    %80 = vector.load %arg3[%c624, %c0_60] : memref<880x256xbf16, #tpu.memory_space<vmem>>, vector<128x256xbf16>
    %81 = arith.truncf %73 : vector<16x128xf32> to vector<16x128xbf16>
    %cst_61 = arith.constant dense<0.000000e+00> : vector<16x256xf32>
    %82 = tpu.matmul %81, %80, %cst_61 {dimension_numbers = #tpu.dot_dimension_numbers<[1], [0], [0], [1], [0, 0, 1, 1], [], []>} : vector<16x128xbf16>, vector<128x256xbf16>, vector<16x256xf32> -> vector<16x256xf32>
    %c2 = arith.constant 2 : index
    %c0_62 = arith.constant 0 : index
    %83 = vector.load %arg4[%c2, %c0_62] : memref<8x256xf32, #tpu.memory_space<vmem>>, vector<1x256xf32>
    %84 = vector.broadcast %83 : vector<1x256xf32> to vector<16x256xf32>
    %85 = arith.addf %82, %84 : vector<16x256xf32>
    %86 = vector.extract_strided_slice %85 {offsets = [0, 0], sizes = [16, 128], strides = [1, 1]} : vector<16x256xf32> to vector<16x128xf32>
    %87 = vector.extract_strided_slice %85 {offsets = [0, 128], sizes = [16, 128], strides = [1, 1]} : vector<16x256xf32> to vector<16x128xf32>
    %cst_63 = arith.constant dense<0.000000e+00> : vector<1x16xf32>
    %88 = tpu.matmul %79, %86, %cst_63 {dimension_numbers = #tpu.dot_dimension_numbers<[1], [1], [0], [0], [0, 0, 1, 0], [], []>} : vector<1x128xf32>, vector<16x128xf32>, vector<1x16xf32> -> vector<1x16xf32>
    %cst_64 = arith.constant dense<0xFF800000> : vector<1xf32>
    %89 = vector.multi_reduction <maximumf>, %88, %cst_64 [1] : vector<1x16xf32> to vector<1xf32>
    %90 = vector.shape_cast %89 : vector<1xf32> to vector<1x1xf32>
    %91 = vector.broadcast %90 : vector<1x1xf32> to vector<1x16xf32>
    %92 = arith.subf %88, %91 : vector<1x16xf32>
    %93 = math.exp %92 : vector<1x16xf32>
    %cst_65 = arith.constant dense<0.000000e+00> : vector<1xf32>
    %94 = vector.multi_reduction <add>, %93, %cst_65 [1] : vector<1x16xf32> to vector<1xf32>
    %95 = vector.shape_cast %94 : vector<1xf32> to vector<1x1xf32>
    %96 = vector.broadcast %95 : vector<1x1xf32> to vector<1x16xf32>
    %97 = arith.divf %93, %96 : vector<1x16xf32>
    %cst_66 = arith.constant dense<0.000000e+00> : vector<1x128xf32>
    %98 = tpu.matmul %97, %87, %cst_66 {dimension_numbers = #tpu.dot_dimension_numbers<[1], [0], [0], [1], [0, 0, 1, 1], [], []>} : vector<1x16xf32>, vector<16x128xf32>, vector<1x128xf32> -> vector<1x128xf32>
    %c752 = arith.constant 752 : index
    %c0_67 = arith.constant 0 : index
    %99 = vector.load %arg3[%c752, %c0_67] : memref<880x256xbf16, #tpu.memory_space<vmem>>, vector<128x256xbf16>
    %100 = arith.truncf %98 : vector<1x128xf32> to vector<1x128xbf16>
    %cst_68 = arith.constant dense<0.000000e+00> : vector<1x256xf32>
    %101 = tpu.matmul %100, %99, %cst_68 {dimension_numbers = #tpu.dot_dimension_numbers<[1], [0], [0], [1], [0, 0, 1, 1], [], []>} : vector<1x128xbf16>, vector<128x256xbf16>, vector<1x256xf32> -> vector<1x256xf32>
    %c3 = arith.constant 3 : index
    %c0_69 = arith.constant 0 : index
    %102 = vector.load %arg4[%c3, %c0_69] : memref<8x256xf32, #tpu.memory_space<vmem>>, vector<1x256xf32>
    %103 = arith.addf %101, %102 : vector<1x256xf32>
    %c0_70 = arith.constant 0 : index
    %c0_71 = arith.constant 0 : index
    %104 = vector.load %arg5[%c0_70, %c0_71] : memref<1x256xf32, #tpu.memory_space<vmem>>, vector<1x256xf32>
    tpu.vector_store %arg5[%c0_70, %c0_71], %103 {strides = array<i32>} : memref<1x256xf32, #tpu.memory_space<vmem>>, vector<1x256xf32>,
    return
  }
  func.func @transform_0(%arg0: i32) -> (i32, i32) {
    %c0_i32 = arith.constant 0 : i32
    %c0_i32_0 = arith.constant 0 : i32
    %c0_i32_1 = arith.constant 0 : i32
    return %c0_i32, %c0_i32_0 : i32, i32
  }
  func.func @transform_1(%arg0: i32) -> (i32, i32) {
    %c0_i32 = arith.constant 0 : i32
    %c0_i32_0 = arith.constant 0 : i32
    %c0_i32_1 = arith.constant 0 : i32
    return %c0_i32, %c0_i32_0 : i32, i32
  }
  func.func @transform_2(%arg0: i32) -> (i32, i32) {
    %c0_i32 = arith.constant 0 : i32
    %c0_i32_0 = arith.constant 0 : i32
    %c0_i32_1 = arith.constant 0 : i32
    return %c0_i32, %c0_i32_0 : i32, i32
  }
  func.func @transform_3(%arg0: i32) -> (i32, i32) {
    %c0_i32 = arith.constant 0 : i32
    %c0_i32_0 = arith.constant 0 : i32
    %c0_i32_1 = arith.constant 0 : i32
    return %c0_i32, %c0_i32_0 : i32, i32
  }
  func.func @transform_4(%arg0: i32) -> (i32, i32) {
    %c0_i32 = arith.constant 0 : i32
    %c0_i32_0 = arith.constant 0 : i32
    %c0_i32_1 = arith.constant 0 : i32
    return %c0_i32, %c0_i32_0 : i32, i32
  }
}

</mosaic_0001>

<bundles_post_ra>
// kernel: cross_attention_forward.1
= control target key start
LH: loop header
LB: loop body
LE: loop exit
PB: predicated region body
PF: predicated region fallthrough
CT: control target
= control target key end

     0   :  { %vm147_vm0 = vcmask 261120   ;;  %s5011_s0 = inlined_call_operand.vmem [shape: bf16[256,32], index: 0, kind: input, shape index: {}]   ;;  %s5012_s1 = inlined_call_operand.vmem [shape: f32[1,16], index: 1, kind: input, shape index: {}]   ;;  %s5013_s2 = inlined_call_operand.vmem [shape: bf16[880,256], index: 2, kind: input, shape index: {}]   ;;  %s5014_s3 = inlined_call_operand.vmem [shape: f32[8,256], index: 3, kind: input, shape index: {}]   ;;  %s5015_s4 = inlined_call_operand.hbm [shape: f32[1,256], index: 4, kind: output, shape index: {}]  }
   0x1   :  { %v3975_v0 = vld [vmem:[%s5013_s2 + $0x240] ss:$8 sps:$4 sm:$0xff]   ;;  %v3976_v1 = vld [vmem:[%s5013_s2 + $0x250] ss:$8 sps:$4 sm:$0xff]  }
   0x2   :  { %3511 = vmatprep.subr.bf16.mxu0 %v3975_v0  ;;  %v3977_v2 = vld [vmem:[%s5011_s0] sm:$0xff]   ;;  %3900 = vmatprep.subr.bf16.mxu1 %v3975_v0  ;;  %v3978_v3 = vld [vmem:[%s5011_s0 + $0x8] sm:$0xff]   ;;  %v3979_v4 = vld [vmem:[%s5011_s0 + $0x10] sm:$0xff]  }
   0x3   :  { %3512 = vmatpush3.bf16.msra.mxu0 %v3975_v0  ;;  %3902 = vmatpush3.bf16.msra.mxu1 %v3975_v0  ;;  %v3985_v5 = vld [vmem:[%s5011_s0 + $0x60] sm:$0xff]   ;;  %v3986_v6 = vld [vmem:[%s5011_s0 + $0x68] sm:$0xff]   ;;  %v3980_v7 = vld [vmem:[%s5011_s0 + $0x18] sm:$0xff]  }
   0x4   :  { %3513 = vmatprep.subr.bf16.mxu0 %v3976_v1  ;;  %3515 = vmatprep.mubr.msk.bf16.mxu0 %vm147_vm0, %v3977_v2  ;;  %v3989_v8 = vld [vmem:[%s5011_s0 + $0x70] sm:$0xff]   ;;  %v3981_v9 = vld [vmem:[%s5011_s0 + $0x20] sm:$0xff]   ;;  %v3990_v10 = vld [vmem:[%s5011_s0 + $0x78] sm:$0xff]  }
   0x5   :  { %3901 = vmatprep.subr.bf16.mxu1 %v3976_v1  ;;  %3539 = vmatprep.mubr.msk.bf16.mxu1 %vm147_vm0, %v3985_v5  ;;  %v3982_v11 = vld [vmem:[%s5011_s0 + $0x28] sm:$0xff]   ;;  %v3983_v12 = vld [vmem:[%s5011_s0 + $0x30] sm:$0xff]   ;;  %v3984_v13 = vld [vmem:[%s5011_s0 + $0x38] sm:$0xff]  }
   0x6   :  { %v3987_v14 = vld [vmem:[%s5011_s0 + $0x40] sm:$0xff]   ;;  %v3988_v15 = vld [vmem:[%s5011_s0 + $0x48] sm:$0xff]   ;;  %v3991_v16 = vld [vmem:[%s5011_s0 + $0x50] sm:$0xff]  }
   0x7   :  { %3514 = vmatpush3.bf16.msra.mxu0 %v3976_v1  ;;  %3903 = vmatpush3.bf16.msra.mxu1 %v3976_v1  ;;  %v3992_v17 = vld [vmem:[%s5011_s0 + $0x58] sm:$0xff]  }
   0xa   :  { %3516 = vmatmul.mubr.msk.bf16.vlgmr.msra.gmra.mrb[0].mxu0 %vm147_vm0, %v3978_v3  ;;  %3540 = vmatmul.mubr.msk.bf16.vlgmr.msra.gmra.mrb[0].mxu1 %vm147_vm0, %v3986_v6 }
   0xb   :  { %3519 = vmatprep.mubr.msk.bf16.mxu0 %vm147_vm0, %v3979_v4  ;;  %3543 = vmatprep.mubr.msk.bf16.mxu1 %vm147_vm0, %v3989_v8 }
  0x12   :  { %3520 = vmatmul.mubr.msk.bf16.gmra.mrb[4].mxu0 %vm147_vm0, %v3980_v7  ;;  %3544 = vmatmul.mubr.msk.bf16.gmra.mrb[4].mxu1 %vm147_vm0, %v3990_v10 }
  0x13   :  { %3523 = vmatprep.mubr.msk.bf16.mxu0 %vm147_vm0, %v3981_v9 }
  0x1a   :  { %3524 = vmatmul.mubr.msk.bf16.gmra.mrb[8].mxu0 %vm147_vm0, %v3982_v11 }
  0x1b   :  { %3527 = vmatprep.mubr.msk.bf16.mxu0 %vm147_vm0, %v3983_v12 }
  0x22   :  { %3528 = vmatmul.mubr.msk.bf16.gmra.mrb[12].mxu0 %vm147_vm0, %v3984_v13 }
  0x23   :  { %3531 = vmatprep.mubr.msk.bf16.mxu0 %vm147_vm0, %v3987_v14 }
  0x2a   :  { %3532 = vmatmul.mubr.msk.bf16.gmra.mrb[16].mxu0 %vm147_vm0, %v3988_v15 }
  0x2b   :  { %3535 = vmatprep.mubr.msk.bf16.mxu0 %vm147_vm0, %v3991_v16 }
  0x32   :  { %3536 = vmatmul.mubr.msk.bf16.gmra.mrb[20].mxu0 %vm147_vm0, %v3992_v17 }
  0x33   :  { %9 = vsyncpa [#allocation3], 0  ;;  %v3993_v18 = vld [vmem:[%s5013_s2 + $0x4] ss:$8 sps:$4 sm:$0xff]   ;;  %vm453_vm1 = vcmask 523264   ;;  %vm4144_vm2 = vmmov 0  }
  0x34   :  { %v3995_v19 = vld [vmem:[%s5013_s2 + $0x84] ss:$8 sps:$4 sm:$0xff]   ;;  %3555 = vmatprep.mubr.msk.bf16.mxu1 %vm453_vm1, %v3993_v18  ;;  %vm2544_vm3 = vcmask 130048   ;;  %vm2841_vm4 = vcmask 122880  }
  0x35   :  { %3619 = vmatprep.mubr.msk.bf16.mxu0 %vm453_vm1, %v3995_v19 }
  0xdd   :  { %v3517_v20 = vpop.f32.mrb[0].mxu0  ;;  %v3541_v24 = vpop.f32.mrb[0].mxu1 }
  0xde   :  { %v230_v21 = vpop.f32.mrb[1].mxu0  ;;  %v326_v25 = vpop.f32.mrb[1].mxu1  ;;  %v359_v37 = vmax.f32 %v3517_v20, 0.0  ;;  %v383_v4 = vmax.f32 %v3541_v24, 0.0 }
  0xdf   :  { %v3518_v22 = vpop.f32.mrb[2].mxu0  ;;  %v3542_v26 = vpop.f32.mrb[2].mxu1  ;;  %v357_v40 = vmax.f32 %v230_v21, 0.0  ;;  %v381_v5 = vmax.f32 %v326_v25, 0.0 }
  0xe0   :  { %v233_v23 = vpop.f32.mrb[3].mxu0  ;;  %v329_v27 = vpop.f32.mrb[3].mxu1  ;;  %v360_v43 = vmax.f32 %v3518_v22, 0.0  ;;  %v384_v11 = vmax.f32 %v3542_v26, 0.0 }
  0xe1   :  { %v358_v47 = vmax.f32 %v233_v23, 0.0  ;;  %v382_v15 = vmax.f32 %v329_v27, 0.0 }
  0xe5   :  { %v3521_v28 = vpop.f32.mrb[4].mxu0  ;;  %v4251_v32 = vpop.f32.mrb[4].mxu1 }
  0xe6   :  { %v246_v29 = vpop.f32.mrb[5].mxu0  ;;  %v4253_v33 = vpop.f32.mrb[5].mxu1  ;;  %v363_v53 = vmax.f32 %v3521_v28, 0.0  ;;  %v387_v23 = vmax.f32 %v4251_v32, 0.0 }
  0xe7   :  { %v3522_v30 = vpop.f32.mrb[6].mxu0  ;;  %v4255_v34 = vpop.f32.mrb[6].mxu1  ;;  %v361_v56 = vmax.f32 %v246_v29, 0.0  ;;  %v385_v25 = vmax.f32 %v4253_v33, 0.0 }
  0xe8   :  { %v249_v31 = vpop.f32.mrb[7].mxu0  ;;  %v4257_v35 = vpop.f32.mrb[7].mxu1  ;;  %v364_v59 = vmax.f32 %v3522_v30, 0.0 }
  0xe9   :  { %v362_v63 = vmax.f32 %v249_v31, 0.0 }
  0xed   :  { %v3525_v36 = vpop.f32.mrb[8].mxu0 }
  0xee   :  { %v367_v38 = vmax.f32 %v3525_v36, 0.0  ;;  %v262_v39 = vpop.f32.mrb[9].mxu0 }
  0xef   :  { %v365_v41 = vmax.f32 %v262_v39, 0.0  ;;  %v3526_v42 = vpop.f32.mrb[10].mxu0 }
  0xf0   :  { %v391_v44 = vmax.f32 %v359_v37, %v367_v38  ;;  %v368_v45 = vmax.f32 %v3526_v42, 0.0  ;;  %v265_v46 = vpop.f32.mrb[11].mxu0  ;;  %v388_v37 = vmax.f32 %v4255_v34, 0.0 }
  0xf1   :  { %v389_v48 = vmax.f32 %v357_v40, %v365_v41  ;;  %v366_v49 = vmax.f32 %v265_v46, 0.0  ;;  %v386_v41 = vmax.f32 %v4257_v35, 0.0 }
  0xf2   :  { %v392_v50 = vmax.f32 %v360_v43, %v368_v45 }
  0xf3   :  { %v390_v51 = vmax.f32 %v358_v47, %v366_v49  ;;  %v3996_v49 = vld [vmem:[%s5013_s2 + $0x94] ss:$8 sps:$4 sm:$0xff]  }
  0xf5   :  { %v3529_v52 = vpop.f32.mrb[12].mxu0 }
  0xf6   :  { %v371_v54 = vmax.f32 %v3529_v52, 0.0  ;;  %v278_v55 = vpop.f32.mrb[13].mxu0  ;;  %v3998_v52 = vld [vmem:[%s5013_s2 + $0x34] ss:$8 sps:$4 sm:$0xff]  }
  0xf7   :  { %v369_v57 = vmax.f32 %v278_v55, 0.0  ;;  %v3530_v58 = vpop.f32.mrb[14].mxu0  ;;  %v4003_v55 = vld [vmem:[%s5013_s2 + $0xc4] ss:$8 sps:$4 sm:$0xff]  }
  0xf8   :  { %v395_v60 = vmax.f32 %v363_v53, %v371_v54  ;;  %v372_v61 = vmax.f32 %v3530_v58, 0.0  ;;  %v281_v62 = vpop.f32.mrb[15].mxu0  ;;  %v4000_v53 = vld [vmem:[%s5013_s2 + $0xb4] ss:$8 sps:$4 sm:$0xff]   ;;  %v4001_v54 = vld [vmem:[%s5013_s2 + $0x44] ss:$8 sps:$4 sm:$0xff]  }
  0xf9   :  { %v393_v0 = vmax.f32 %v361_v56, %v369_v57  ;;  %v370_v1 = vmax.f32 %v281_v62, 0.0  ;;  %v4002_v56 = vld [vmem:[%s5013_s2 + $0x54] ss:$8 sps:$4 sm:$0xff]   ;;  %v4005_v58 = vld [vmem:[%s5013_s2 + $0x64] ss:$8 sps:$4 sm:$0xff]  }
  0xfa   :  { %v396_v2 = vmax.f32 %v364_v59, %v372_v61  ;;  %v4004_v57 = vld [vmem:[%s5013_s2 + $0xd4] ss:$8 sps:$4 sm:$0xff]   ;;  %v4007_v59 = vld [vmem:[%s5013_s2 + $0xe4] ss:$8 sps:$4 sm:$0xff]  }
  0xfb   :  { %v394_v3 = vmax.f32 %v362_v63, %v370_v1  ;;  %v4008_v61 = vld [vmem:[%s5013_s2 + $0xf4] ss:$8 sps:$4 sm:$0xff]   ;;  %v4009_v62 = vld [vmem:[%s5013_s2 + $0x104] ss:$8 sps:$4 sm:$0xff]  }
  0xfc   :  { %v4010_v63 = vld [vmem:[%s5013_s2 + $0x114] ss:$8 sps:$4 sm:$0xff]  }
  0xfd   :  { %v3533_v6 = vpop.f32.mrb[16].mxu0  ;;  %v4012_v1 = vld [vmem:[%s5013_s2 + $0x134] ss:$8 sps:$4 sm:$0xff]  }
  0xfe   :  { %v375_v7 = vmax.f32 %v3533_v6, 0.0  ;;  %v294_v8 = vpop.f32.mrb[17].mxu0  ;;  %v4017_v6 = vld [vmem:[%s5013_s2 + $0x184] ss:$8 sps:$4 sm:$0xff]  }
  0xff   :  { %v373_v9 = vmax.f32 %v294_v8, 0.0  ;;  %v3534_v10 = vpop.f32.mrb[18].mxu0  ;;  %v4019_v8 = vld [vmem:[%s5013_s2 + $0x1a4] ss:$8 sps:$4 sm:$0xff]  }
 0x100   :  { %v399_v12 = vmax.f32 %v375_v7, %v383_v4  ;;  %v376_v13 = vmax.f32 %v3534_v10, 0.0  ;;  %v297_v14 = vpop.f32.mrb[19].mxu0  ;;  %v4015_v4 = vld [vmem:[%s5013_s2 + $0x164] ss:$8 sps:$4 sm:$0xff]   ;;  %v4018_v7 = vld [vmem:[%s5013_s2 + $0x194] ss:$8 sps:$4 sm:$0xff]  }
 0x101   :  { %v397_v16 = vmax.f32 %v373_v9, %v381_v5  ;;  %v374_v17 = vmax.f32 %v297_v14, 0.0  ;;  %v4016_v5 = vld [vmem:[%s5013_s2 + $0x174] ss:$8 sps:$4 sm:$0xff]   ;;  %v4021_v10 = vld [vmem:[%s5013_s2 + $0x1c4] ss:$8 sps:$4 sm:$0xff]  }
 0x102   :  { %v407_v18 = vmax.f32 %v391_v44, %v399_v12  ;;  %v400_v19 = vmax.f32 %v376_v13, %v384_v11  ;;  %v4020_v9 = vld [vmem:[%s5013_s2 + $0x1b4] ss:$8 sps:$4 sm:$0xff]   ;;  %v4023_v12 = vld [vmem:[%s5013_s2 + $0x1e4] ss:$8 sps:$4 sm:$0xff]  }
 0x103   :  { %v405_v20 = vmax.f32 %v389_v48, %v397_v16  ;;  %v398_v21 = vmax.f32 %v374_v17, %v382_v15  ;;  %v3994_v48 = vld [vmem:[%s5013_s2 + $0x14] ss:$8 sps:$4 sm:$0xff]   ;;  %v4025_v14 = vld [vmem:[%s5013_s2 + $0x204] ss:$8 sps:$4 sm:$0xff]   ;;  %v4029_v15 = vld [vmem:[%s5013_s2 + $0x40] ss:$8 sps:$4 sm:$0xff]  }
 0x104   :  { %v408_v22 = vmax.f32 %v392_v50, %v400_v19  ;;  %v3997_v50 = vld [vmem:[%s5013_s2 + $0x24] ss:$8 sps:$4 sm:$0xff]   ;;  %v4022_v11 = vld [vmem:[%s5013_s2 + $0x1d4] ss:$8 sps:$4 sm:$0xff]   ;;  %v4030_v17 = vld [vmem:[%s5013_s2 + $0x50] ss:$8 sps:$4 sm:$0xff]  }
 0x105   :  { %v406_v24 = vmax.f32 %v390_v51, %v398_v21  ;;  %v3537_v28 = vpop.f32.mrb[20].mxu0  ;;  %v3999_v51 = vld [vmem:[%s5013_s2 + $0xa4] ss:$8 sps:$4 sm:$0xff]   ;;  %v4024_v13 = vld [vmem:[%s5013_s2 + $0x1f4] ss:$8 sps:$4 sm:$0xff]  }
 0x106   :  { %v4261_v29 = vpack.c.bf16 %v408_v22, %v407_v18  ;;  %v379_v26 = vmax.f32 %v3537_v28, 0.0  ;;  %v310_v30 = vpop.f32.mrb[21].mxu0  ;;  %v4026_v16 = vld [vmem:[%s5013_s2 + $0x214] ss:$8 sps:$4 sm:$0xff]   ;;  %v4027_v18 = vld [vmem:[%s5013_s2 + $0x224] ss:$8 sps:$4 sm:$0xff]  }
 0x107   :  { %v4263_v31 = vpack.c.bf16 %v406_v24, %v405_v20  ;;  %v377_v27 = vmax.f32 %v310_v30, 0.0  ;;  %v3538_v36 = vpop.f32.mrb[22].mxu0  ;;  %v4031_v19 = vld [vmem:[%s5013_s2 + $0x60] ss:$8 sps:$4 sm:$0xff]   ;;  %v4028_v20 = vld [vmem:[%s5013_s2 + $0x234] ss:$8 sps:$4 sm:$0xff]  }
 0x108   :  { %v403_v38 = vmax.f32 %v379_v26, %v387_v23  ;;  %v380_v39 = vmax.f32 %v3538_v36, 0.0  ;;  %v313_v40 = vpop.f32.mrb[23].mxu0  ;;  %v4032_v21 = vld [vmem:[%s5013_s2 + $0x70] ss:$8 sps:$4 sm:$0xff]   ;;  %v4033_v22 = vld [vmem:[%s5013_s2] ss:$8 sps:$4 sm:$0xff]  }
 0x109   :  { %v401_v32 = vmax.f32 %v377_v27, %v385_v25  ;;  %v378_v42 = vmax.f32 %v313_v40, 0.0  ;;  %3547 = vmatprep.subr.bf16.mxu1 %v4263_v31  ;;  %3611 = vmatprep.subr.bf16.mxu0 %v4263_v31 }
 0x10a   :  { %v411_v33 = vmax.f32 %v395_v60, %v403_v38  ;;  %v404_v43 = vmax.f32 %v380_v39, %v388_v37  ;;  %3548 = vmatpush3.bf16.msra.mxu1 %v4263_v31  ;;  %3612 = vmatpush3.bf16.msra.mxu0 %v4263_v31  ;;  %v4006_v60 = vld [vmem:[%s5013_s2 + $0x74] ss:$8 sps:$4 sm:$0xff]  }
 0x10b   :  { %v409_v44 = vmax.f32 %v393_v0, %v401_v32  ;;  %v402_v45 = vmax.f32 %v378_v42, %v386_v41  ;;  %3549 = vmatprep.subr.bf16.mxu1 %v4261_v29  ;;  %3613 = vmatprep.subr.bf16.mxu0 %v4261_v29  ;;  %v4011_v0 = vld [vmem:[%s5013_s2 + $0x124] ss:$8 sps:$4 sm:$0xff]  }
 0x10c   :  { %v412_v34 = vmax.f32 %v396_v2, %v404_v43  ;;  %v4013_v2 = vld [vmem:[%s5013_s2 + $0x144] ss:$8 sps:$4 sm:$0xff]  }
 0x10d   :  { %v410_v35 = vmax.f32 %v394_v3, %v402_v45  ;;  %v4014_v3 = vld [vmem:[%s5013_s2 + $0x154] ss:$8 sps:$4 sm:$0xff]  }
 0x10e   :  { %v4273_v46 = vpack.c.bf16 %v412_v34, %v411_v33  ;;  %3550 = vmatpush3.bf16.msra.mxu1 %v4261_v29  ;;  %3614 = vmatpush3.bf16.msra.mxu0 %v4261_v29 }
 0x10f   :  { %v4277_v47 = vpack.c.bf16 %v410_v35, %v409_v44 }
 0x111   :  { %3551 = vmatprep.subr.bf16.mxu1 %v4277_v47  ;;  %3615 = vmatprep.subr.bf16.mxu0 %v4277_v47 }
 0x112   :  { %3552 = vmatpush3.bf16.msra.mxu1 %v4277_v47  ;;  %3616 = vmatpush3.bf16.msra.mxu0 %v4277_v47 }
 0x113   :  { %3553 = vmatprep.subr.bf16.mxu1 %v4273_v46  ;;  %3617 = vmatprep.subr.bf16.mxu0 %v4273_v46 }
 0x116   :  { %3554 = vmatpush3.bf16.msra.mxu1 %v4273_v46  ;;  %3618 = vmatpush3.bf16.msra.mxu0 %v4273_v46 }
 0x117   :  { %3563 = vmatprep.subr.bf16.mxu1 %v4263_v31  ;;  %3643 = vmatprep.subr.bf16.mxu0 %v4263_v31 }
 0x119   :  { %3556 = vmatmul.mubr.msk.bf16.vlgmr.msra.gmra.mrb[8].mxu1 %vm453_vm1, %v3994_v48  ;;  %3620 = vmatmul.mubr.msk.bf16.vlgmr.msra.gmra.mrb[24].mxu0 %vm453_vm1, %v3996_v49 }
 0x11a   :  { %3564 = vmatpush3.bf16.msra.mxu1 %v4263_v31  ;;  %3644 = vmatpush3.bf16.msra.mxu0 %v4263_v31 }
 0x11b   :  { %3565 = vmatprep.subr.bf16.mxu1 %v4261_v29  ;;  %3645 = vmatprep.subr.bf16.mxu0 %v4261_v29 }
 0x11c   :  { %3559 = vmatprep.mubr.msk.bf16.mxu1 %vm453_vm1, %v3997_v50  ;;  %3623 = vmatprep.mubr.msk.bf16.mxu0 %vm453_vm1, %v3999_v51 }
 0x11e   :  { %3566 = vmatpush3.bf16.msra.mxu1 %v4261_v29  ;;  %3646 = vmatpush3.bf16.msra.mxu0 %v4261_v29 }
 0x11f   :  { %3567 = vmatprep.subr.bf16.mxu1 %v4277_v47  ;;  %3647 = vmatprep.subr.bf16.mxu0 %v4277_v47 }
 0x121   :  { %3560 = vmatmul.mubr.msk.bf16.gmra.mrb[12].mxu1 %vm453_vm1, %v3998_v52  ;;  %3624 = vmatmul.mubr.msk.bf16.gmra.mrb[28].mxu0 %vm453_vm1, %v4000_v53 }
 0x122   :  { %3568 = vmatpush3.bf16.msra.mxu1 %v4277_v47  ;;  %3648 = vmatpush3.bf16.msra.mxu0 %v4277_v47 }
 0x123   :  { %3569 = vmatprep.subr.bf16.mxu1 %v4273_v46  ;;  %3649 = vmatprep.subr.bf16.mxu0 %v4273_v46 }
 0x124   :  { %3571 = vmatprep.mubr.msk.bf16.mxu1 %vm453_vm1, %v4001_v54  ;;  %3651 = vmatprep.mubr.msk.bf16.mxu0 %vm453_vm1, %v4003_v55 }
 0x126   :  { %3570 = vmatpush3.bf16.msra.mxu1 %v4273_v46  ;;  %3650 = vmatpush3.bf16.msra.mxu0 %v4273_v46 }
 0x127   :  { %3675 = vmatprep.subr.bf16.mxu0 %v4263_v31  ;;  %3579 = vmatprep.subr.bf16.mxu1 %v4029_v15 }
 0x129   :  { %3572 = vmatmul.mubr.msk.bf16.vlgmr.msra.gmra.mrb[16].mxu1 %vm453_vm1, %v4002_v56  ;;  %3652 = vmatmul.mubr.msk.bf16.vlgmr.msra.gmra.mrb[32].mxu0 %vm453_vm1, %v4004_v57 }
 0x12a   :  { %3676 = vmatpush3.bf16.msra.mxu0 %v4263_v31  ;;  %3575 = vmatprep.mubr.msk.bf16.mxu1 %vm453_vm1, %v4005_v58 }
 0x12b   :  { %3677 = vmatprep.subr.bf16.mxu0 %v4261_v29  ;;  %3655 = vmatprep.mubr.msk.bf16.mxu0 %vm453_vm1, %v4007_v59  ;;  %v4034_v59 = vld [vmem:[%s5013_s2 + $0x10] ss:$8 sps:$4 sm:$0xff]  }
 0x12c   :  { %3580 = vmatpush3.bf16.msra.mxu1 %v4029_v15 }
 0x12d   :  { %3581 = vmatprep.subr.bf16.mxu1 %v4030_v17 }
 0x12e   :  { %3678 = vmatpush3.bf16.msra.mxu0 %v4261_v29 }
 0x12f   :  { %3679 = vmatprep.subr.bf16.mxu0 %v4277_v47 }
 0x130   :  { %3582 = vmatpush3.bf16.msra.mxu1 %v4030_v17  ;;  %v4038_v17 = vld [vmem:[%s5013_s2 + $0x90] ss:$8 sps:$4 sm:$0xff]  }
 0x131   :  { %3576 = vmatmul.mubr.msk.bf16.gmra.mrb[20].mxu1 %vm453_vm1, %v4006_v60  ;;  %3656 = vmatmul.mubr.msk.bf16.gmra.mrb[36].mxu0 %vm453_vm1, %v4008_v61 }
 0x132   :  { %3680 = vmatpush3.bf16.msra.mxu0 %v4277_v47  ;;  %3683 = vmatprep.mubr.msk.bf16.mxu0 %vm453_vm1, %v4009_v62 }
 0x133   :  { %3681 = vmatprep.subr.bf16.mxu0 %v4273_v46  ;;  %3583 = vmatprep.subr.bf16.mxu1 %v4031_v19 }
 0x134   :  { %3584 = vmatpush3.bf16.msra.mxu1 %v4031_v19  ;;  %v4039_v19 = vld [vmem:[%s5013_s2 + $0xa0] ss:$8 sps:$4 sm:$0xff]  }
 0x135   :  { %3585 = vmatprep.subr.bf16.mxu1 %v4032_v21 }
 0x136   :  { %3682 = vmatpush3.bf16.msra.mxu0 %v4273_v46 }
 0x137   :  { %3707 = vmatprep.subr.bf16.mxu0 %v4263_v31 }
 0x138   :  { %3586 = vmatpush3.bf16.msra.mxu1 %v4032_v21 }
 0x139   :  { %3684 = vmatmul.mubr.msk.bf16.vlgmr.msra.gmra.mrb[40].mxu0 %vm453_vm1, %v4010_v63  ;;  %3595 = vmatprep.subr.bf16.mxu1 %v4033_v22  ;;  %v4035_v63 = vld [vmem:[%s5013_s2 + $0x20] ss:$8 sps:$4 sm:$0xff]  }
 0x13a   :  { %3708 = vmatpush3.bf16.msra.mxu0 %v4263_v31  ;;  %3687 = vmatprep.mubr.msk.bf16.mxu0 %vm453_vm1, %v4011_v0 }
 0x13b   :  { %3709 = vmatprep.subr.bf16.mxu0 %v4261_v29 }
 0x13e   :  { %3710 = vmatpush3.bf16.msra.mxu0 %v4261_v29 }
 0x13f   :  { %3711 = vmatprep.subr.bf16.mxu0 %v4277_v47 }
 0x141   :  { %3688 = vmatmul.mubr.msk.bf16.gmra.mrb[44].mxu0 %vm453_vm1, %v4012_v1 }
 0x142   :  { %3712 = vmatpush3.bf16.msra.mxu0 %v4277_v47  ;;  %3715 = vmatprep.mubr.msk.bf16.mxu0 %vm453_vm1, %v4013_v2 }
 0x143   :  { %3713 = vmatprep.subr.bf16.mxu0 %v4273_v46 }
 0x146   :  { %3714 = vmatpush3.bf16.msra.mxu0 %v4273_v46 }
 0x147   :  { %3739 = vmatprep.subr.bf16.mxu0 %v4263_v31 }
 0x149   :  { %3716 = vmatmul.mubr.msk.bf16.vlgmr.msra.gmra.mrb[48].mxu0 %vm453_vm1, %v4014_v3 }
 0x14a   :  { %3740 = vmatpush3.bf16.msra.mxu0 %v4263_v31  ;;  %3719 = vmatprep.mubr.msk.bf16.mxu0 %vm453_vm1, %v4015_v4 }
 0x14b   :  { %3741 = vmatprep.subr.bf16.mxu0 %v4261_v29 }
 0x14e   :  { %3742 = vmatpush3.bf16.msra.mxu0 %v4261_v29 }
 0x14f   :  { %3743 = vmatprep.subr.bf16.mxu0 %v4277_v47 }
 0x151   :  { %3720 = vmatmul.mubr.msk.bf16.gmra.mrb[52].mxu0 %vm453_vm1, %v4016_v5 }
 0x152   :  { %3744 = vmatpush3.bf16.msra.mxu0 %v4277_v47  ;;  %3747 = vmatprep.mubr.msk.bf16.mxu0 %vm453_vm1, %v4017_v6 }
 0x153   :  { %3745 = vmatprep.subr.bf16.mxu0 %v4273_v46 }
 0x156   :  { %3746 = vmatpush3.bf16.msra.mxu0 %v4273_v46 }
 0x157   :  { %3771 = vmatprep.subr.bf16.mxu0 %v4263_v31 }
 0x159   :  { %3748 = vmatmul.mubr.msk.bf16.vlgmr.msra.gmra.mrb[56].mxu0 %vm453_vm1, %v4018_v7 }
 0x15a   :  { %3772 = vmatpush3.bf16.msra.mxu0 %v4263_v31  ;;  %3751 = vmatprep.mubr.msk.bf16.mxu0 %vm453_vm1, %v4019_v8 }
 0x15b   :  { %3773 = vmatprep.subr.bf16.mxu0 %v4261_v29 }
 0x15e   :  { %3774 = vmatpush3.bf16.msra.mxu0 %v4261_v29 }
 0x15f   :  { %3775 = vmatprep.subr.bf16.mxu0 %v4277_v47 }
 0x161   :  { %3752 = vmatmul.mubr.msk.bf16.gmra.mrb[60].mxu0 %vm453_vm1, %v4020_v9  ;;  %v4036_v9 = vld [vmem:[%s5013_s2 + $0x30] ss:$8 sps:$4 sm:$0xff]  }
 0x162   :  { %3776 = vmatpush3.bf16.msra.mxu0 %v4277_v47  ;;  %3779 = vmatprep.mubr.msk.bf16.mxu0 %vm453_vm1, %v4021_v10 }
 0x163   :  { %3777 = vmatprep.subr.bf16.mxu0 %v4273_v46 }
 0x166   :  { %3778 = vmatpush3.bf16.msra.mxu0 %v4273_v46 }
 0x167   :  { %3803 = vmatprep.subr.bf16.mxu0 %v4263_v31 }
 0x169   :  { %3780 = vmatmul.mubr.msk.bf16.vlgmr.msra.gmra.mrb[64].mxu0 %vm453_vm1, %v4022_v11  ;;  %v4037_v11 = vld [vmem:[%s5013_s2 + $0x80] ss:$8 sps:$4 sm:$0xff]  }
 0x16a   :  { %3804 = vmatpush3.bf16.msra.mxu0 %v4263_v31  ;;  %3783 = vmatprep.mubr.msk.bf16.mxu0 %vm453_vm1, %v4023_v12 }
 0x16b   :  { %3805 = vmatprep.subr.bf16.mxu0 %v4261_v29 }
 0x16e   :  { %3806 = vmatpush3.bf16.msra.mxu0 %v4261_v29 }
 0x16f   :  { %3807 = vmatprep.subr.bf16.mxu0 %v4277_v47 }
 0x171   :  { %3784 = vmatmul.mubr.msk.bf16.gmra.mrb[68].mxu0 %vm453_vm1, %v4024_v13 }
 0x172   :  { %3808 = vmatpush3.bf16.msra.mxu0 %v4277_v47  ;;  %3811 = vmatprep.mubr.msk.bf16.mxu0 %vm453_vm1, %v4025_v14 }
 0x173   :  { %3809 = vmatprep.subr.bf16.mxu0 %v4273_v46 }
 0x176   :  { %3810 = vmatpush3.bf16.msra.mxu0 %v4273_v46 }
 0x179   :  { %3812 = vmatmul.mubr.msk.bf16.vlgmr.msra.gmra.mrb[72].mxu0 %vm453_vm1, %v4026_v16 }
 0x17a   :  { %3815 = vmatprep.mubr.msk.bf16.mxu0 %vm453_vm1, %v4027_v18 }
 0x181   :  { %3816 = vmatmul.mubr.msk.bf16.gmra.mrb[76].mxu0 %vm453_vm1, %v4028_v20 }
 0x1ec   :  { %v4494_v23 = vpop.f32.mrb[8].mxu1  ;;  %v4496_v24 = vpop.f32.mrb[24].mxu0 }
 0x1ed   :  { %v500_v25 = vpop.f32.mrb[9].mxu1  ;;  %v4498_v28 = vpop.f32.mrb[25].mxu0 }
 0x1ee   :  { %v4500_v29 = vpop.f32.mrb[10].mxu1  ;;  %v4502_v26 = vpop.f32.mrb[26].mxu0 }
 0x1ef   :  { %v532_v30 = vpack.c.bf16 %v4500_v29, %v4494_v23  ;;  %v503_v31 = vpop.f32.mrb[11].mxu1  ;;  %v968_v27 = vpack.c.bf16 %v4502_v26, %v4496_v24  ;;  %v4508_v36 = vpop.f32.mrb[27].mxu0  ;;  %v4040_v29 = vld [vmem:[%s5013_s2 + $0xb0] ss:$8 sps:$4 sm:$0xff]  }
 0x1f0   :  { %v531_v37 = vpack.c.bf16 %v503_v31, %v500_v25  ;;  %v967_v38 = vpack.c.bf16 %v4508_v36, %v4498_v28  ;;  %v4041_v31 = vld [vmem:[%s5013_s2 + $0xc0] ss:$8 sps:$4 sm:$0xff]   ;;  %v4042_v36 = vld [vmem:[%s5013_s2 + $0xd0] ss:$8 sps:$4 sm:$0xff]  }
 0x1f4   :  { %v4512_v39 = vpop.f32.mrb[12].mxu1  ;;  %v4514_v40 = vpop.f32.mrb[28].mxu0 }
 0x1f5   :  { %v516_v41 = vpop.f32.mrb[13].mxu1  ;;  %v4516_v32 = vpop.f32.mrb[29].mxu0 }
 0x1f6   :  { %v4518_v42 = vpop.f32.mrb[14].mxu1  ;;  %v4520_v33 = vpop.f32.mrb[30].mxu0 }
 0x1f7   :  { %v534_v43 = vpack.c.bf16 %v4518_v42, %v4512_v39  ;;  %v519_v44 = vpop.f32.mrb[15].mxu1  ;;  %v970_v45 = vpack.c.bf16 %v4520_v33, %v4514_v40  ;;  %v4526_v34 = vpop.f32.mrb[31].mxu0 }
 0x1f8   :  { %v533_v35 = vpack.c.bf16 %v519_v44, %v516_v41  ;;  %v969_v46 = vpack.c.bf16 %v4526_v34, %v4516_v32  ;;  %v4044_v32 = vld [vmem:[%s5013_s2 + $0xf0] ss:$8 sps:$4 sm:$0xff]  }
 0x1fc   :  { %v3573_v47 = vpop.f32.mrb[16].mxu1  ;;  %v4530_v48 = vpop.f32.mrb[32].mxu0 }
 0x1fd   :  { %v617_v49 = vpop.f32.mrb[17].mxu1  ;;  %v4532_v50 = vpop.f32.mrb[33].mxu0 }
 0x1fe   :  { %v3574_v51 = vpop.f32.mrb[18].mxu1  ;;  %v4534_v52 = vpop.f32.mrb[34].mxu0 }
 0x1ff   :  { %v649_v53 = vpack.c.bf16 %v3574_v51, %v3573_v47  ;;  %v620_v54 = vpop.f32.mrb[19].mxu1  ;;  %v1194_v55 = vpack.c.bf16 %v4534_v52, %v4530_v48  ;;  %v4538_v56 = vpop.f32.mrb[35].mxu0 }
 0x200   :  { %v648_v57 = vpack.c.bf16 %v620_v54, %v617_v49  ;;  %v1193_v58 = vpack.c.bf16 %v4538_v56, %v4532_v50  ;;  %v4046_v50 = vld [vmem:[%s5013_s2 + $0x110] ss:$8 sps:$4 sm:$0xff]  }
 0x202   :  { %3587 = vmatprep.mubr.msk.bf16.mxu1 %vm453_vm1, %v648_v57  ;;  %v4048_v57 = vld [vmem:[%s5013_s2 + $0x130] ss:$8 sps:$4 sm:$0xff]  }
 0x203   :  { %3588 = vmatmul.mubr.msk.bf16.vlgmr.msra.gmra.mrb[24].mxu1 %vm453_vm1, %v649_v53  ;;  %v4047_v53 = vld [vmem:[%s5013_s2 + $0x120] ss:$8 sps:$4 sm:$0xff]  }
 0x204   :  { %v3577_v60 = vpop.f32.mrb[20].mxu1  ;;  %3596 = vmatpush3.bf16.msra.mxu1 %v4033_v22  ;;  %v4547_v61 = vpop.f32.mrb[36].mxu0 }
 0x205   :  { %v633_v62 = vpop.f32.mrb[21].mxu1  ;;  %3597 = vmatprep.subr.bf16.mxu1 %v4034_v59  ;;  %v4552_v0 = vpop.f32.mrb[37].mxu0 }
 0x206   :  { %v3578_v1 = vpop.f32.mrb[22].mxu1  ;;  %v4554_v2 = vpop.f32.mrb[38].mxu0 }
 0x207   :  { %v651_v3 = vpack.c.bf16 %v3578_v1, %v3577_v60  ;;  %v636_v4 = vpop.f32.mrb[23].mxu1  ;;  %v1196_v5 = vpack.c.bf16 %v4554_v2, %v4547_v61  ;;  %v4558_v6 = vpop.f32.mrb[39].mxu0  ;;  %v4050_v1 = vld [vmem:[%s5013_s2 + $0x150] ss:$8 sps:$4 sm:$0xff]  }
 0x208   :  { %v650_v7 = vpack.c.bf16 %v636_v4, %v633_v62  ;;  %3598 = vmatpush3.bf16.msra.mxu1 %v4034_v59  ;;  %v1195_v8 = vpack.c.bf16 %v4558_v6, %v4552_v0  ;;  %v4049_v59 = vld [vmem:[%s5013_s2 + $0x140] ss:$8 sps:$4 sm:$0xff]  }
 0x209   :  { %3599 = vmatprep.subr.bf16.mxu1 %v4035_v63 }
 0x20a   :  { %3591 = vmatprep.mubr.msk.bf16.mxu1 %vm453_vm1, %v650_v7 }
 0x20b   :  { %3592 = vmatmul.mubr.msk.bf16.gmra.mrb[28].mxu1 %vm453_vm1, %v651_v3  ;;  %v4051_v3 = vld [vmem:[%s5013_s2 + $0x160] ss:$8 sps:$4 sm:$0xff]  }
 0x20c   :  { %3600 = vmatpush3.bf16.msra.mxu1 %v4035_v63  ;;  %3603 = vmatprep.mubr.msk.bf16.mxu1 %vm453_vm1, %v531_v37  ;;  %v4568_v10 = vpop.f32.mrb[40].mxu0 }
 0x20d   :  { %3601 = vmatprep.subr.bf16.mxu1 %v4036_v9  ;;  %v4573_v12 = vpop.f32.mrb[41].mxu0 }
 0x20e   :  { %v4575_v13 = vpop.f32.mrb[42].mxu0 }
 0x20f   :  { %v1420_v14 = vpack.c.bf16 %v4575_v13, %v4568_v10  ;;  %v4579_v15 = vpop.f32.mrb[43].mxu0 }
 0x210   :  { %3602 = vmatpush3.bf16.msra.mxu1 %v4036_v9  ;;  %v1419_v16 = vpack.c.bf16 %v4579_v15, %v4573_v12  ;;  %v4052_v9 = vld [vmem:[%s5013_s2 + $0x170] ss:$8 sps:$4 sm:$0xff]  }
 0x211   :  { %3627 = vmatprep.subr.bf16.mxu1 %v4037_v11 }
 0x213   :  { %3604 = vmatmul.mubr.msk.bf16.vlgmr.msra.gmra.mrb[24].mxu1 %vm453_vm1, %v532_v30 }
 0x214   :  { %3607 = vmatprep.mubr.msk.bf16.mxu1 %vm453_vm1, %v533_v35  ;;  %3628 = vmatpush3.bf16.msra.mxu1 %v4037_v11  ;;  %v4591_v18 = vpop.f32.mrb[44].mxu0  ;;  %v4053_v11 = vld [vmem:[%s5013_s2 + $0x180] ss:$8 sps:$4 sm:$0xff]  }
 0x215   :  { %3629 = vmatprep.subr.bf16.mxu1 %v4038_v17  ;;  %v4596_v20 = vpop.f32.mrb[45].mxu0 }
 0x216   :  { %v4598_v21 = vpop.f32.mrb[46].mxu0 }
 0x217   :  { %v1422_v22 = vpack.c.bf16 %v4598_v21, %v4591_v18  ;;  %v4602_v23 = vpop.f32.mrb[47].mxu0 }
 0x218   :  { %3630 = vmatpush3.bf16.msra.mxu1 %v4038_v17  ;;  %v1421_v25 = vpack.c.bf16 %v4602_v23, %v4596_v20  ;;  %v4054_v17 = vld [vmem:[%s5013_s2 + $0x190] ss:$8 sps:$4 sm:$0xff]  }
 0x219   :  { %3631 = vmatprep.subr.bf16.mxu1 %v4039_v19 }
 0x21b   :  { %3608 = vmatmul.mubr.msk.bf16.gmra.mrb[28].mxu1 %vm453_vm1, %v534_v43  ;;  %v4043_v43 = vld [vmem:[%s5013_s2 + $0xe0] ss:$8 sps:$4 sm:$0xff]  }
 0x21c   :  { %3632 = vmatpush3.bf16.msra.mxu1 %v4039_v19  ;;  %3635 = vmatprep.mubr.msk.bf16.mxu1 %vm453_vm1, %v967_v38  ;;  %v4617_v30 = vpop.f32.mrb[48].mxu0  ;;  %v4055_v19 = vld [vmem:[%s5013_s2 + $0x1a0] ss:$8 sps:$4 sm:$0xff]  }
 0x21d   :  { %3633 = vmatprep.subr.bf16.mxu1 %v4040_v29  ;;  %v4622_v37 = vpop.f32.mrb[49].mxu0 }
 0x21e   :  { %v4624_v41 = vpop.f32.mrb[50].mxu0 }
 0x21f   :  { %v1646_v39 = vpack.c.bf16 %v4624_v41, %v4617_v30  ;;  %v4628_v42 = vpop.f32.mrb[51].mxu0  ;;  %v4057_v30 = vld [vmem:[%s5013_s2 + $0x1c0] ss:$8 sps:$4 sm:$0xff]   ;;  %v4060_v41 = vld [vmem:[%s5013_s2 + $0x1f0] ss:$8 sps:$4 sm:$0xff]  }
 0x220   :  { %3634 = vmatpush3.bf16.msra.mxu1 %v4040_v29  ;;  %v1645_v28 = vpack.c.bf16 %v4628_v42, %v4622_v37  ;;  %v4056_v29 = vld [vmem:[%s5013_s2 + $0x1b0] ss:$8 sps:$4 sm:$0xff]   ;;  %v4059_v37 = vld [vmem:[%s5013_s2 + $0x1e0] ss:$8 sps:$4 sm:$0xff]  }
 0x221   :  { %3659 = vmatprep.subr.bf16.mxu1 %v4041_v31  ;;  %v4062_v42 = vld [vmem:[%s5013_s2 + $0x210] ss:$8 sps:$4 sm:$0xff]  }
 0x223   :  { %3636 = vmatmul.mubr.msk.bf16.vlgmr.msra.gmra.mrb[24].mxu1 %vm453_vm1, %v968_v27 }
 0x224   :  { %3660 = vmatpush3.bf16.msra.mxu1 %v4041_v31  ;;  %3639 = vmatprep.mubr.msk.bf16.mxu1 %vm453_vm1, %v969_v46  ;;  %v4643_v38 = vpop.f32.mrb[52].mxu0  ;;  %v4045_v46 = vld [vmem:[%s5013_s2 + $0x100] ss:$8 sps:$4 sm:$0xff]   ;;  %v4058_v31 = vld [vmem:[%s5013_s2 + $0x1d0] ss:$8 sps:$4 sm:$0xff]  }
 0x225   :  { %3661 = vmatprep.subr.bf16.mxu1 %v4042_v36  ;;  %v4648_v44 = vpop.f32.mrb[53].mxu0 }
 0x226   :  { %v4650_v35 = vpop.f32.mrb[54].mxu0 }
 0x227   :  { %v1648_v24 = vpack.c.bf16 %v4650_v35, %v4643_v38  ;;  %v4654_v26 = vpop.f32.mrb[55].mxu0  ;;  %v4857_v38 = vld [vmem:[%s5013_s2 + $0x264] ss:$8 sps:$4 sm:$0xff]   ;;  %v4067_v35 = vld [vmem:[%s5013_s2 + $0x274] ss:$8 sps:$4 sm:$0xff]  }
 0x228   :  { %3662 = vmatpush3.bf16.msra.mxu1 %v4042_v36  ;;  %v1647_v27 = vpack.c.bf16 %v4654_v26, %v4648_v44  ;;  %v4064_v36 = vld [vmem:[%s5013_s2 + $0x230] ss:$8 sps:$4 sm:$0xff]   ;;  %v4068_v26 = vld [vmem:[%s5013_s2 + $0x280] ss:$8 sps:$4 sm:$0xff]  }
 0x229   :  { %3663 = vmatprep.subr.bf16.mxu1 %v4043_v43  ;;  %v4065_v44 = vld [vmem:[%s5013_s2 + $0x270] ss:$8 sps:$4 sm:$0xff]  }
 0x22b   :  { %3640 = vmatmul.mubr.msk.bf16.gmra.mrb[28].mxu1 %vm453_vm1, %v970_v45 }
 0x22c   :  { %3664 = vmatpush3.bf16.msra.mxu1 %v4043_v43  ;;  %3667 = vmatprep.mubr.msk.bf16.mxu1 %vm453_vm1, %v1193_v58  ;;  %v4669_v34 = vpop.f32.mrb[56].mxu0  ;;  %v2455_v43 = vunpack.c.l.bf16 %v4857_v38 }
 0x22d   :  { %3665 = vmatprep.subr.bf16.mxu1 %v4044_v32  ;;  %v4674_v47 = vpop.f32.mrb[57].mxu0 }
 0x22e   :  { %v4676_v49 = vpop.f32.mrb[58].mxu0  ;;  %3851 = vmatprep.mubr.msk.f32.mxu0 %vm453_vm1, %v2455_v43 }
 0x22f   :  { %v1872_v40 = vpack.c.bf16 %v4676_v49, %v4669_v34  ;;  %v4680_v33 = vpop.f32.mrb[59].mxu0  ;;  %v4076_v34 = vld [vmem:[%s5013_s2 + $0x2a4] ss:$8 sps:$4 sm:$0xff]   ;;  %v4077_v49 = vld [vmem:[%s5013_s2 + $0x2b0] ss:$8 sps:$4 sm:$0xff]  }
 0x230   :  { %3666 = vmatpush3.bf16.msra.mxu1 %v4044_v32  ;;  %v1871_v45 = vpack.c.bf16 %v4680_v33, %v4674_v47  ;;  %v4071_v32 = vld [vmem:[%s5013_s2 + $0x290] ss:$8 sps:$4 sm:$0xff]   ;;  %v4079_v47 = vld [vmem:[%s5013_s2 + $0x2b4] ss:$8 sps:$4 sm:$0xff]   ;;  %v4080_v33 = vld [vmem:[%s5013_s2 + $0x2c0] ss:$8 sps:$4 sm:$0xff]  }
 0x231   :  { %3691 = vmatprep.subr.bf16.mxu1 %v4045_v46 }
 0x233   :  { %3668 = vmatmul.mubr.msk.bf16.vlgmr.msra.gmra.mrb[24].mxu1 %vm453_vm1, %v1194_v55 }
 0x234   :  { %3692 = vmatpush3.bf16.msra.mxu1 %v4045_v46  ;;  %3671 = vmatprep.mubr.msk.bf16.mxu1 %vm453_vm1, %v1195_v8  ;;  %v4695_v51 = vpop.f32.mrb[60].mxu0  ;;  %v4074_v46 = vld [vmem:[%s5013_s2 + $0x2a0] ss:$8 sps:$4 sm:$0xff]  }
 0x235   :  { %3693 = vmatprep.subr.bf16.mxu1 %v4046_v50  ;;  %v4700_v54 = vpop.f32.mrb[61].mxu0 }
 0x236   :  { %v4702_v56 = vpop.f32.mrb[62].mxu0 }
 0x237   :  { %v1874_v48 = vpack.c.bf16 %v4702_v56, %v4695_v51  ;;  %v4706_v52 = vpop.f32.mrb[63].mxu0  ;;  %v2436_v51 = vld [vmem:[%s5014_s3] ss:$0 sm:$0xff] }
 0x238   :  { %3694 = vmatpush3.bf16.msra.mxu1 %v4046_v50  ;;  %v1873_v55 = vpack.c.bf16 %v4706_v52, %v4700_v54  ;;  %v4083_v50 = vld [vmem:[%s5013_s2 + $0x2d0] ss:$8 sps:$4 sm:$0xff]  }
 0x239   :  { %3695 = vmatprep.subr.bf16.mxu1 %v4047_v53 }
 0x23b   :  { %3672 = vmatmul.mubr.msk.bf16.gmra.mrb[28].mxu1 %vm453_vm1, %v1196_v5 }
 0x23c   :  { %3696 = vmatpush3.bf16.msra.mxu1 %v4047_v53  ;;  %3699 = vmatprep.mubr.msk.bf16.mxu1 %vm453_vm1, %v1419_v16  ;;  %v4721_v58 = vpop.f32.mrb[64].mxu0 }
 0x23d   :  { %3697 = vmatprep.subr.bf16.mxu1 %v4048_v57  ;;  %v4726_v60 = vpop.f32.mrb[65].mxu0 }
 0x23e   :  { %v4728_v62 = vpop.f32.mrb[66].mxu0 }
 0x23f   :  { %v2098_v61 = vpack.c.bf16 %v4728_v62, %v4721_v58  ;;  %v4732_v63 = vpop.f32.mrb[67].mxu0 }
 0x240   :  { %3698 = vmatpush3.bf16.msra.mxu1 %v4048_v57  ;;  %v2097_v0 = vpack.c.bf16 %v4732_v63, %v4726_v60 }
 0x241   :  { %3723 = vmatprep.subr.bf16.mxu1 %v4049_v59 }
 0x243   :  { %3700 = vmatmul.mubr.msk.bf16.vlgmr.msra.gmra.mrb[24].mxu1 %vm453_vm1, %v1420_v14 }
 0x244   :  { %3724 = vmatpush3.bf16.msra.mxu1 %v4049_v59  ;;  %3703 = vmatprep.mubr.msk.bf16.mxu1 %vm453_vm1, %v1421_v25  ;;  %v4747_v2 = vpop.f32.mrb[68].mxu0 }
 0x245   :  { %3725 = vmatprep.subr.bf16.mxu1 %v4050_v1  ;;  %v4752_v4 = vpop.f32.mrb[69].mxu0 }
 0x246   :  { %v4754_v5 = vpop.f32.mrb[70].mxu0 }
 0x247   :  { %v2100_v6 = vpack.c.bf16 %v4754_v5, %v4747_v2  ;;  %v2085_v7 = vpop.f32.mrb[71].mxu0 }
 0x248   :  { %3726 = vmatpush3.bf16.msra.mxu1 %v4050_v1  ;;  %v2099_v8 = vpack.c.bf16 %v2085_v7, %v4752_v4 }
 0x249   :  { %3727 = vmatprep.subr.bf16.mxu1 %v4051_v3 }
 0x24b   :  { %3704 = vmatmul.mubr.msk.bf16.gmra.mrb[28].mxu1 %vm453_vm1, %v1422_v22 }
 0x24c   :  { %3728 = vmatpush3.bf16.msra.mxu1 %v4051_v3  ;;  %3731 = vmatprep.mubr.msk.bf16.mxu1 %vm453_vm1, %v1645_v28  ;;  %v4770_v10 = vpop.f32.mrb[72].mxu0  ;;  %v4063_v28 = vld [vmem:[%s5013_s2 + $0x220] ss:$8 sps:$4 sm:$0xff]  }
 0x24d   :  { %3729 = vmatprep.subr.bf16.mxu1 %v4052_v9  ;;  %v2292_v12 = vpop.f32.mrb[73].mxu0 }
 0x24e   :  { %v3814_v13 = vpop.f32.mrb[74].mxu0 }
 0x24f   :  { %v2324_v14 = vpack.c.bf16 %v3814_v13, %v4770_v10  ;;  %v2295_v15 = vpop.f32.mrb[75].mxu0 }
 0x250   :  { %3730 = vmatpush3.bf16.msra.mxu1 %v4052_v9  ;;  %v2323_v16 = vpack.c.bf16 %v2295_v15, %v2292_v12  ;;  %v2456_v15 = vunpack.c.h.bf16 %v4857_v38 }
 0x251   :  { %3755 = vmatprep.subr.bf16.mxu1 %v4053_v11 }
 0x253   :  { %3732 = vmatmul.mubr.msk.bf16.vlgmr.msra.gmra.mrb[24].mxu1 %vm453_vm1, %v1646_v39  ;;  %v4061_v39 = vld [vmem:[%s5013_s2 + $0x200] ss:$8 sps:$4 sm:$0xff]  }
 0x254   :  { %3756 = vmatpush3.bf16.msra.mxu1 %v4053_v11  ;;  %3735 = vmatprep.mubr.msk.bf16.mxu1 %vm453_vm1, %v1647_v27  ;;  %v3817_v18 = vpop.f32.mrb[76].mxu0  ;;  %v4073_v27 = vld [vmem:[%s5013_s2 + $0x294] ss:$8 sps:$4 sm:$0xff]  }
 0x255   :  { %3757 = vmatprep.subr.bf16.mxu1 %v4054_v17  ;;  %v2308_v20 = vpop.f32.mrb[77].mxu0 }
 0x256   :  { %v3818_v21 = vpop.f32.mrb[78].mxu0 }
 0x257   :  { %v2326_v22 = vpack.c.bf16 %v3818_v21, %v3817_v18  ;;  %v2311_v23 = vpop.f32.mrb[79].mxu0  ;;  %v4142_v18 = vmov 0   ;;  %v4145_v21 = vmov 0.0  }
 0x258   :  { %3758 = vmatpush3.bf16.msra.mxu1 %v4054_v17  ;;  %v2325_v25 = vpack.c.bf16 %v2311_v23, %v2308_v20  ;;  %v4086_v17 = vld [vmem:[%s5013_s2 + $0x2e0] ss:$8 sps:$4 sm:$0xff]   ;;  %v4143_v20 = vmov 0.0|0.0  }
 0x259   :  { %3759 = vmatprep.subr.bf16.mxu1 %v4055_v19 }
 0x25b   :  { %3736 = vmatmul.mubr.msk.bf16.gmra.mrb[28].mxu1 %vm453_vm1, %v1648_v24  ;;  %v4070_v24 = vld [vmem:[%s5013_s2 + $0x284] ss:$8 sps:$4 sm:$0xff]  }
 0x25c   :  { %3760 = vmatpush3.bf16.msra.mxu1 %v4055_v19  ;;  %3763 = vmatprep.mubr.msk.bf16.mxu1 %vm453_vm1, %v1871_v45  ;;  %v4085_v45 = vld [vmem:[%s5013_s2 + $0x2d4] ss:$8 sps:$4 sm:$0xff]   ;;  %v4089_v19 = vld [vmem:[%s5013_s2 + $0x260] ss:$8 sps:$4 sm:$0xff]  }
 0x25d   :  { %3761 = vmatprep.subr.bf16.mxu1 %v4056_v29 }
 0x260   :  { %3762 = vmatpush3.bf16.msra.mxu1 %v4056_v29 }
 0x261   :  { %3787 = vmatprep.subr.bf16.mxu1 %v4057_v30 }
 0x263   :  { %3764 = vmatmul.mubr.msk.bf16.vlgmr.msra.gmra.mrb[24].mxu1 %vm453_vm1, %v1872_v40  ;;  %v4082_v40 = vld [vmem:[%s5013_s2 + $0x2c4] ss:$8 sps:$4 sm:$0xff]  }
 0x264   :  { %3788 = vmatpush3.bf16.msra.mxu1 %v4057_v30  ;;  %3767 = vmatprep.mubr.msk.bf16.mxu1 %vm453_vm1, %v1873_v55 }
 0x265   :  { %3789 = vmatprep.subr.bf16.mxu1 %v4058_v31 }
 0x268   :  { %3790 = vmatpush3.bf16.msra.mxu1 %v4058_v31 }
 0x269   :  { %3791 = vmatprep.subr.bf16.mxu1 %v4059_v37 }
 0x26b   :  { %3768 = vmatmul.mubr.msk.bf16.gmra.mrb[28].mxu1 %vm453_vm1, %v1874_v48 }
 0x26c   :  { %3792 = vmatpush3.bf16.msra.mxu1 %v4059_v37  ;;  %3795 = vmatprep.mubr.msk.bf16.mxu1 %vm453_vm1, %v2097_v0  ;;  %v2638_v37 = vlaneseq }
 0x26d   :  { %3793 = vmatprep.subr.bf16.mxu1 %v4060_v41 }
 0x26e   :  { %vm3097_vm5 = vcmp.lt.s32.totalorder %v2638_v37, 256 }
 0x270   :  { %3794 = vmatpush3.bf16.msra.mxu1 %v4060_v41  ;;  %v4925_v41 = vshrl.u32 %v2638_v37, 7 }
 0x271   :  { %3819 = vmatprep.subr.bf16.mxu1 %v4061_v39 }
 0x273   :  { %3796 = vmatmul.mubr.msk.bf16.vlgmr.msra.gmra.mrb[24].mxu1 %vm453_vm1, %v2098_v61 }
 0x274   :  { %3820 = vmatpush3.bf16.msra.mxu1 %v4061_v39  ;;  %3799 = vmatprep.mubr.msk.bf16.mxu1 %vm453_vm1, %v2099_v8  ;;  %v2640_v39 = vsub.s32 0, %v4925_v41 }
 0x275   :  { %3821 = vmatprep.subr.bf16.mxu1 %v4062_v42 }
 0x278   :  { %3822 = vmatpush3.bf16.msra.mxu1 %v4062_v42  ;;  %v3295_v42 = vld [vmem:[%s5014_s3 + $0x2] ss:$8 sm:$0x3] }
 0x279   :  { %3823 = vmatprep.subr.bf16.mxu1 %v4063_v28 }
 0x27b   :  { %3800 = vmatmul.mubr.msk.bf16.gmra.mrb[28].mxu1 %vm453_vm1, %v2100_v6 }
 0x27c   :  { %3824 = vmatpush3.bf16.msra.mxu1 %v4063_v28  ;;  %3827 = vmatprep.mubr.msk.bf16.mxu1 %vm453_vm1, %v2323_v16  ;;  %v4088_v16 = vld [vmem:[%s5013_s2 + $0x2e4] ss:$8 sps:$4 sm:$0xff]   ;;  %v2644_v28 = vsub.s32 1, %v4925_v41 }
 0x27d   :  { %3825 = vmatprep.subr.bf16.mxu1 %v4064_v36 }
 0x27e   :  { %v2645_v43 = vrot.slane %v3295_v42, %v2644_v28 }
 0x280   :  { %3826 = vmatpush3.bf16.msra.mxu1 %v4064_v36  ;;  %v2641_v36 = vrot.slane %v3295_v42, %v2640_v39 }
 0x281   :  { %2728 = vmatprep.subr.bf16.mxu1 %v4067_v35 }
 0x283   :  { %3828 = vmatmul.mubr.msk.bf16.vlgmr.msra.gmra.mrb[24].mxu1 %vm453_vm1, %v2324_v14 }
 0x284   :  { %3831 = vmatprep.mubr.msk.bf16.mxu1 %vm453_vm1, %v2325_v25  ;;  %2729 = vmatpush1.bf16.msra.mxu1 %v4065_v44 }
 0x285   :  { %2730 = vmatprep.subr.bf16.mxu1 %v4070_v24 }
 0x288   :  { %2731 = vmatpush1.bf16.msra.mxu1 %v4068_v26 }
 0x289   :  { %2732 = vmatprep.subr.bf16.mxu1 %v4073_v27 }
 0x28b   :  { %3832 = vmatmul.mubr.msk.bf16.gmra.mrb[28].mxu1 %vm453_vm1, %v2326_v22  ;;  %v2542_v22 = vld [vmem:[%s5012_s1] sm:$0x1] }
 0x28c   :  { %2733 = vmatpush1.bf16.msra.mxu1 %v4071_v32  ;;  %2760 = vmatprep.mubr.bf16.mxu1 %v4142_v18 }
 0x28d   :  { %2734 = vmatprep.subr.bf16.mxu1 %v4076_v34 }
 0x290   :  { %2735 = vmatpush1.bf16.msra.mxu1 %v4074_v46 }
 0x291   :  { %2736 = vmatprep.subr.bf16.mxu1 %v4079_v47 }
 0x294   :  { %2737 = vmatpush1.bf16.msra.mxu1 %v4077_v49  ;;  %v2543_v49 = vld [vmem:[%s5014_s3 + $0x1] ss:$0 sm:$0xff] }
 0x295   :  { %2738 = vmatprep.subr.bf16.mxu1 %v4082_v40 }
 0x298   :  { %2739 = vmatpush1.bf16.msra.mxu1 %v4080_v33 }
 0x299   :  { %2740 = vmatprep.subr.bf16.mxu1 %v4085_v45 }
 0x29c   :  { %2741 = vmatpush1.bf16.msra.mxu1 %v4083_v50 }
 0x29d   :  { %2742 = vmatprep.subr.bf16.mxu1 %v4088_v16 }
 0x2a0   :  { %2743 = vmatpush1.bf16.msra.mxu1 %v4086_v17 }
 0x356   :  { %v3829_v53 = vpop.f32.mrb[24].mxu1 }
 0x357   :  { %v2439_v54 = vadd.f32 %v3829_v53, %v2436_v51  ;;  %v2397_v56 = vpop.f32.mrb[25].mxu1 }
 0x358   :  { %v2437_v48 = vadd.f32 %v2436_v51, %v2397_v56  ;;  %v3830_v52 = vpop.f32.mrb[26].mxu1 }
 0x359   :  { %v2440_v55 = vadd.f32 %v3830_v52, %v2436_v51  ;;  %v2400_v57 = vpop.f32.mrb[27].mxu1  ;;  %v2447_v59 = vmax.f32 %v2439_v54, 0.0  ;;  %v4092_v52 = vld [vmem:[%s5013_s2 + $0x2f4] ss:$8 sps:$4 sm:$0xff]  }
 0x35a   :  { %v2438_v58 = vadd.f32 %v2436_v51, %v2400_v57  ;;  %v2445_v62 = vmax.f32 %v2437_v48, 0.0 }
 0x35b   :  { %v2448_v60 = vmax.f32 %v2440_v55, 0.0 }
 0x35c   :  { %v2446_v61 = vmax.f32 %v2438_v58, 0.0  ;;  %v4090_v58 = vld [vmem:[%s5013_s2 + $0x2f0] ss:$8 sps:$4 sm:$0xff]  }
 0x35d   :  { %v3879_v63 = vpack.c.bf16 %v2448_v60, %v2447_v59  ;;  %v4095_v60 = vld [vmem:[%s5013_s2 + $0x304] ss:$8 sps:$4 sm:$0xff]  }
 0x35e   :  { %v3875_v0 = vpack.c.bf16 %v2446_v61, %v2445_v62  ;;  %v3833_v1 = vpop.f32.mrb[28].mxu1  ;;  %v4093_v62 = vld [vmem:[%s5013_s2 + $0x300] ss:$8 sps:$4 sm:$0xff]   ;;  %v4098_v61 = vld [vmem:[%s5013_s2 + $0x314] ss:$8 sps:$4 sm:$0xff]  }
 0x35f   :  { %v2443_v2 = vadd.f32 %v3833_v1, %v2436_v51  ;;  %v2413_v3 = vpop.f32.mrb[29].mxu1  ;;  %v4099_v1 = vld [vmem:[%s5013_s2 + $0x320] ss:$8 sps:$4 sm:$0xff]  }
 0x360   :  { %v2441_v4 = vadd.f32 %v2436_v51, %v2413_v3  ;;  %v3834_v5 = vpop.f32.mrb[30].mxu1  ;;  %3876 = vmatprep.subr.bf16.mxu0 %v3875_v0  ;;  %v4102_v3 = vld [vmem:[%s5013_s2 + $0x330] ss:$8 sps:$4 sm:$0xff]  }
 0x361   :  { %v2444_v6 = vadd.f32 %v3834_v5, %v2436_v51  ;;  %v2416_v7 = vpop.f32.mrb[31].mxu1  ;;  %3878 = vmatpush3.bf16.msra.mxu0 %v3875_v0  ;;  %v2451_v9 = vmax.f32 %v2443_v2, 0.0  ;;  %v4101_v0 = vld [vmem:[%s5013_s2 + $0x324] ss:$8 sps:$4 sm:$0xff]   ;;  %v4104_v2 = vld [vmem:[%s5013_s2 + $0x334] ss:$8 sps:$4 sm:$0xff]  }
 0x362   :  { %v2442_v8 = vadd.f32 %v2436_v51, %v2416_v7  ;;  %3880 = vmatprep.subr.bf16.mxu0 %v3879_v63  ;;  %v2449_v11 = vmax.f32 %v2441_v4, 0.0  ;;  %v4107_v4 = vld [vmem:[%s5013_s2 + $0x344] ss:$8 sps:$4 sm:$0xff]   ;;  %v4105_v5 = vld [vmem:[%s5013_s2 + $0x340] ss:$8 sps:$4 sm:$0xff]  }
 0x363   :  { %v2452_v10 = vmax.f32 %v2444_v6, 0.0  ;;  %v4110_v6 = vld [vmem:[%s5013_s2 + $0x354] ss:$8 sps:$4 sm:$0xff]   ;;  %v4108_v7 = vld [vmem:[%s5013_s2 + $0x350] ss:$8 sps:$4 sm:$0xff]  }
 0x364   :  { %v2450_v12 = vmax.f32 %v2442_v8, 0.0  ;;  %v4113_v8 = vld [vmem:[%s5013_s2 + $0x364] ss:$8 sps:$4 sm:$0xff]  }
 0x365   :  { %v3887_v13 = vpack.c.bf16 %v2452_v10, %v2451_v9  ;;  %3882 = vmatpush3.bf16.msra.mxu0 %v3879_v63  ;;  %v4096_v63 = vld [vmem:[%s5013_s2 + $0x310] ss:$8 sps:$4 sm:$0xff]   ;;  %v4111_v9 = vld [vmem:[%s5013_s2 + $0x360] ss:$8 sps:$4 sm:$0xff]   ;;  %s4147_s2 = smov [#allocation2]  }
 0x366   :  { %v3883_v14 = vpack.c.bf16 %v2450_v12, %v2449_v11 }
 0x368   :  { %3884 = vmatprep.subr.bf16.mxu0 %v3883_v14 }
 0x369   :  { %3886 = vmatpush3.bf16.msra.mxu0 %v3883_v14  ;;  %v4146_v14 = vmov 1966171168  }
 0x36a   :  { %3888 = vmatprep.subr.bf16.mxu0 %v3887_v13 }
 0x36d   :  { %3890 = vmatpush3.bf16.msra.mxu0 %v3887_v13  ;;  %v3313_v13 = vld [vmem:[%s5014_s3 + $0x3] ss:$8 sm:$0x3]  ;;  %s3106_s3 = sshll.u32 %s4147_s2, 4  ;;  %s3107_s3 = int_to_ptr.vmem [resolvable:$true] %s3106_s3 }
 0x36e   :  { %3891 = vmatprep.subr.bf16.mxu0 %v4143_v20  ;;  %v3029_v16 = vrot.slane %v3313_v13, %v2640_v39  ;;  %v3033_v17 = vrot.slane %v3313_v13, %v2644_v28  ;;  %s4118_s0 = scalar_lea.vmem %s3107_s3, 32  ;;  %p4123_p1 = scmp.lt.s32.totalorder %s3107_s3, %s3107_s3 }
 0x36f   :  { %p4119_p0 = scmp.ne.s32.totalorder %s3107_s3, %s4118_s0  ;;  %p4124_p2 = scmp.lt.s32.totalorder %s4118_s0, %s4118_s0 }
 0x370   :  { %3852 = vmatmul.mubr.msk.f32.vlgmr.msra.gmra.mrb[80].mxu0 %vm453_vm1, %v2456_v15  ;;  %v3081_v15 = vunpack.c.l.s4 %v4146_v14 }
 0x371   :  { %3858 = vmatprep.mubr.msk.f32.mxu0 %vm4144_vm2, %v4145_v21  ;;  %3893 = vmatpush3.bf16.msra.mxu0 %v4089_v19  ;;  %p4125_p3 = por %p4124_p2, %p4123_p1 }
 0x372   :  { %3894 = vmatprep.subr.bf16.mxu0 %v4143_v20 }
 0x373   :  { %p4126_p4 = pnand %p4125_p3, %p4119_p0 }
 0x374   :  { %3859 = vmatmul.mubr.msk.f32.vlgmr.msra.gmra.mrb[82].mxu0 %vm2544_vm3, %v2542_v22 }
 0x375   :  { %3865 = vmatprep.mubr.msk.f32.mxu0 %vm4144_vm2, %v4145_v21 }
 0x443   :  { %v3853_v23 = vpop.f32.mrb[80].mxu0 }
 0x444   :  { %v2529_v25 = vpop.f32.mrb[81].mxu0 }
 0x445   :  { %v2634_v29 = vpack.c.bf16 %v3853_v23, %v2529_v25 }
 0x447   :  { %2761 = vmatmul.mubr.bf16.vlgmr.msra.gmra.mrb[32].mxu1 %v2634_v29  ;;  %v2614_v30 = vpop.f32.mrb[82].mxu0 }
 0x448   :  { %v3860_v31 = vpop.f32.mrb[83].mxu0  ;;  %v2615_v40 = vadd.f32 %v2614_v30, %v2543_v49 }
 0x51a   :  { %v2762_v38 = vpop.f32.mrb[32].mxu1 }
 0x51b   :  { %v2764_v44 = vpop.f32.mrb[33].mxu1  ;;  %v2763_v24 = vadd.f32 %v2762_v38, %v2641_v36 }
 0x51c   :  { %v2766_v35 = vpop.f32.mrb[34].mxu1  ;;  %v2765_v32 = vadd.f32 %v2764_v44, %v2645_v43 }
 0x51d   :  { %v2767_v26 = vadd.f32 %v2766_v35, %v2641_v36  ;;  %v2768_v27 = vpop.f32.mrb[35].mxu1 }
 0x51e   :  { %v2769_v34 = vadd.f32 %v2768_v27, %v2645_v43 }
 0x51f   :  { %v3895_v46 = vpack.c.bf16 %v2767_v26, %v2763_v24 }
 0x520   :  { %v3898_v47 = vpack.c.bf16 %v2769_v34, %v2765_v32 }
 0x521   :  { %3896 = vmatpush3.bf16.xpose.msra.mxu0 %v3895_v46 }
 0x522   :  { %3897 = vmatprep.subr.bf16.mxu0 %v4143_v20 }
 0x528   :  { %3866 = vmatmul.mubr.f32.vlgmr.msra.gmra.mrb[84].mxu0 %v2615_v40 }
 0x529   :  { %3899 = vmatpush3.bf16.msra.mxu0 %v3898_v47  ;;  %3872 = vmatprep.mubr.msk.f32.mxu0 %vm4144_vm2, %v4145_v21 }
 0x52a   :  { %3036 = vmatprep.subr.bf16.mxu0 %v4092_v52 }
 0x5fb   :  { %v2837_v33 = vpop.f32.mrb[84].mxu0 }
 0x5fc   :  { %v3867_v45 = vpop.f32.mrb[85].mxu0  ;;  %v2842_v50 = vsel %vm2841_vm4, %v2837_v33, -inf }
 0x5fd   :  { %2843 = vmax.xlane.f32.xlu0 %v2842_v50 }
 0x68a   :  { %v2844_v51 = vpop.xlane.xlu0 %2843 }
 0x68b   :  { %v2845_v53 = vsub.f32 %v2837_v33, %v2844_v51 }
 0x68d   :  { %v2846_v54 = vmul.f32 1.442695, %v2845_v53 }
 0x68f   :  { %4114 = vpow2.f32 %v2846_v54 }
 0x699   :  { %v4115_v56 = vpop.eup %4114 }
 0x69a   :  { %v2848_v48 = vsel %vm2841_vm4, %v4115_v56, 0.0 }
 0x69b   :  { %2849 = vadd.xlane.f32.xlu0 %v2848_v48 }
 0x728   :  { %v2850_v55 = vpop.xlane.xlu0 %2849 }
 0x729   :  { %4116 = vrcp.f32 %v2850_v55 }
 0x733   :  { %v4117_v57 = vpop.eup %4116 }
 0x734   :  { %v2852_v59 = vmul.f32 %v4117_v57, %v4115_v56 }
 0x736   :  { %3873 = vmatmul.mubr.msk.f32.vlgmr.msra.gmra.mrb[86].mxu0 %vm2544_vm3, %v2852_v59 }
 0x737   :  { %3037 = vmatpush1.bf16.msra.mxu0 %v4090_v58  ;;  %3068 = vmatprep.mubr.bf16.mxu0 %v4142_v18  ;;  %v3082_v18 = vunpack.c.0.s8 %v3081_v15 }
 0x738   :  { %3038 = vmatprep.subr.bf16.mxu0 %v4095_v60 }
 0x739   :  { %v3085_v23 = vsub.s32 %v3082_v18, %v4925_v41 }
 0x73b   :  { %3039 = vmatpush1.bf16.msra.mxu0 %v4093_v62 }
 0x73c   :  { %3040 = vmatprep.subr.bf16.mxu0 %v4098_v61 }
 0x73f   :  { %3041 = vmatpush1.bf16.msra.mxu0 %v4096_v63 }
 0x740   :  { %3042 = vmatprep.subr.bf16.mxu0 %v4101_v0 }
 0x743   :  { %3043 = vmatpush1.bf16.msra.mxu0 %v4099_v1 }
 0x744   :  { %3044 = vmatprep.subr.bf16.mxu0 %v4104_v2 }
 0x747   :  { %3045 = vmatpush1.bf16.msra.mxu0 %v4102_v3 }
 0x748   :  { %3046 = vmatprep.subr.bf16.mxu0 %v4107_v4 }
 0x74b   :  { %3047 = vmatpush1.bf16.msra.mxu0 %v4105_v5 }
 0x74c   :  { %3048 = vmatprep.subr.bf16.mxu0 %v4110_v6 }
 0x74f   :  { %3049 = vmatpush1.bf16.msra.mxu0 %v4108_v7 }
 0x750   :  { %3050 = vmatprep.subr.bf16.mxu0 %v4113_v8 }
 0x753   :  { %3051 = vmatpush1.bf16.msra.mxu0 %v4111_v9 }
 0x809   :  { %v2922_v10 = vpop.f32.mrb[86].mxu0 }
 0x80a   :  { %v2942_v11 = vpack.c.bf16 %v2922_v10, %v2922_v10  ;;  %v3874_v12 = vpop.f32.mrb[87].mxu0 }
 0x80c   :  { %3069 = vmatmul.mubr.bf16.vlgmr.msra.gmra.mrb[88].mxu0 %v2942_v11 }
 0x8df   :  { %v3070_v19 = vpop.f32.mrb[88].mxu0 }
 0x8e0   :  { %v3071_v20 = vadd.f32 %v3070_v19, %v3029_v16  ;;  %v3072_v21 = vpop.f32.mrb[89].mxu0 }
 0x8e1   :  { %v3073_v22 = vadd.f32 %v3072_v21, %v3033_v17  ;;  %v3074_v25 = vpop.f32.mrb[90].mxu0 }
 0x8e2   :  { %v3075_v29 = vpop.f32.mrb[91].mxu0 }
 0x8e3   :  { %v3079_v30 = vcombine.low %v3071_v20, %v3073_v22 }
 0x8e5   :  { %v3086_v31 = vrot.slane %v3079_v30, %v3085_v23 }
 0x8e7   :  { %v3093_v42 = vrot.slane %v3086_v31, %v3085_v23 }
 0x8e9   :  { %3099 = vst.msk [vmem:[#allocation2] sm:$0x3] %vm3097_vm5, %v3093_v42 }
 0x8ea   :  { %4129 = shalt.err (!%p4126_p4)
}
 0x8eb   :  { %s4130_s5 = scalar_lea.hbm %s5015_s4, 32 }
 0x8ec   :  { %p4131_p5 = scmp.ne.s32.totalorder %s5015_s4, %s4130_s5  ;;  %p4134_p6 = scmp.lt.u32.totalorder %s4130_s5, %s5015_s4 }
 0x8ee   :  { %p4136_p7 = pnand %p4134_p6, %p4131_p5 }
 0x8f0   :  { %4139 = shalt.err (!%p4136_p7)
}
 0x8f1   :  { %3109 = dma.vmem_to_hbm [thread:$0]  %s3107_s3, 32, %s5015_s4, [#allocation3]  }
 0x8f2   :  { %4140 = dma.done.wait [#allocation3], 32  }
 0x8f3   :  { %4141 = vsyncadd [#allocation3], 4294967264 }
 0x8f4   :  { %3113 = vsyncpa [#allocation3], 1 }

</bundles_post_ra>
